<compile_context>
chip_gen: v7x
topology: tpu7x:2x2x1
jax: 0.10.0
libtpu: 0.0.40
codegen_flags: <defaults>
</compile_context>

<pallas_src>
import functools

import jax
import jax.numpy as jnp
from jax import lax
from jax.experimental import pallas as pl
from jax.experimental.pallas import tpu as pltpu


def _round_up(x, m):
    return ((x + m - 1) // m) * m


def _sigmoid(x):
    # sigmoid(x) = 0.5*(tanh(0.5x)+1): one EUP tanh push + VPU ops on the serial
    # chain instead of exp + reciprocal.
    return 0.5 * jnp.tanh(0.5 * x) + 0.5


def _pick_time_chunk(T, Bsh, E, Hp, *, max_chunk, budget_bytes=20 << 20):
    """Largest power-of-two-ish chunk whose VMEM footprint fits the budget."""
    def footprint(ct):
        return (2 * ct * Bsh * E * 2            # emb bf16 input, double-buffered
                + 2 * ct * Bsh * Hp * 4         # out f32 output, double-buffered
                + ct * Bsh * 4 * Hp * 4         # gx scratch f32
                + 2 * (E + Hp) * 4 * Hp * 2     # W_ih + W_hh bf16 (2 buffers)
                + 2 * 4 * Hp * 4                # bias f32
                + 3 * Bsh * Hp * 4)             # h/c carries + c_out block
    ct = max(1, min(max_chunk, T))
    while ct > 1 and footprint(ct) > budget_bytes:
        ct //= 2
    vmem_limit = int(min(64 << 20, max(32 << 20, 2 * footprint(ct))))
    return ct, vmem_limit


# -----------------------------------------------------------------------------
# Fused LSTM kernel: per time-chunk input projection + sequential recurrence.
#   emb_ref : (CT, Bsh, E)  bf16 embedded inputs for this (batch-shard, chunk)
#   wih_ref : (E, 4*Hp)     bf16 input weights   (resident, constant index_map)
#   whh_ref : (Hp, 4*Hp)    bf16 recurrent weights (resident)
#   bias_ref: (1, 4*Hp)     f32 combined bias
#   out_ref : (CT, Bsh, Hp) f32 per-step hidden states
#   c_out   : (Bsh, Hp)     f32 final cell state (written on last chunk)
#   gx_sc   : (CT*Bsh, 4Hp) f32 scratch for the chunk's input projection
#   h_sc/c_sc: f32 carries across chunks (per batch shard / per core)
# -----------------------------------------------------------------------------
def _lstm_chunk_kernel(emb_ref, wih_ref, whh_ref, bias_ref, out_ref, c_out_ref,
                       gx_sc, h_sc, c_sc, *, chunk, tail, unroll):
    c_idx = pl.program_id(1)                  # time-chunk axis (sequential)
    Bsh, Hp = h_sc.shape
    E = emb_ref.shape[-1]

    @pl.when(c_idx == 0)
    def _init():
        h_sc[...] = jnp.zeros_like(h_sc)
        c_sc[...] = jnp.zeros_like(c_sc)

    # --- fused input projection for the whole chunk (batch-parallel, fills the
    # MXU off the serial critical path; bf16 x bf16 -> f32 accumulate). The
    # reshape only merges leading dims (lane layout unchanged).
    emb2d = emb_ref[...].reshape(chunk * Bsh, E)
    gx_sc[...] = (
        jnp.dot(emb2d, wih_ref[...], preferred_element_type=jnp.float32)
        + bias_ref[...]
    )

    whh = whh_ref[...]        # resident bf16 recurrent weights, loaded per chunk
    # TODO(synk): hold W_hh in MXU weight registers across the chunk
    # (pltpu.matmul_push_rhs / matmul_acc_lhs / matmul_pop) once the (Hp, 4Hp)
    # RHS is tiled to the systolic-array width; skipped here for portability.

    def step(s, carry):
        h, c = carry                           # f32 carries
        row = pl.multiple_of(s * Bsh, 8)       # sublane-aligned chunk row
        gates = gx_sc[pl.ds(row, Bsh), :] + jnp.dot(
            h.astype(jnp.bfloat16), whh, preferred_element_type=jnp.float32)
        i_g = _sigmoid(gates[:, 0 * Hp:1 * Hp])   # lane-aligned gate slabs
        f_g = _sigmoid(gates[:, 1 * Hp:2 * Hp])
        g_g = jnp.tanh(gates[:, 2 * Hp:3 * Hp])
        o_g = _sigmoid(gates[:, 3 * Hp:4 * Hp])
        c_new = f_g * c + i_g * g_g
        h_new = o_g * jnp.tanh(c_new)
        out_ref[s] = h_new                        # full-lane (Hp) store
        return (h_new, c_new)

    def run_steps(n_steps):
        h_f, c_f = lax.fori_loop(0, n_steps, step, (h_sc[...], c_sc[...]),
                                 unroll=min(unroll, n_steps))
        h_sc[...] = h_f
        c_sc[...] = c_f

    last = pl.num_programs(1) - 1
    if tail == chunk:
        # CT divides T: single loop, no per-step validity predicate anywhere.
        run_steps(chunk)
    else:
        # Tail epilogue: only the last chunk runs a shorter trip count; the
        # per-step jnp.where freeze is gone from the serial chain.
        @pl.when(c_idx != last)
        def _full():
            run_steps(chunk)

        @pl.when(c_idx == last)
        def _tail():
            run_steps(tail)

    @pl.when(c_idx == last)
    def _final():
        c_out_ref[...] = c_sc[...]     # final hidden state aliases out[T-1]


# -----------------------------------------------------------------------------
# Wrapper: repack weights (gate-major, lane-padded, bf16), run the fused kernel.
# -----------------------------------------------------------------------------
def lstm_pallas(embedded, w_ih, w_hh, b_ih, b_hh, *, time_chunk=64):
    """embedded: (T, B, E) f32.  PyTorch layout: w_ih (4H, E), w_hh (4H, H),
    gate order [i, f, g, o].  Returns (out (T,B,H), (h_n (1,B,H), c_n (1,B,H)))."""
    T, B, E = embedded.shape
    H = w_hh.shape[1]
    f32, bf16 = jnp.float32, jnp.bfloat16

    Hp = _round_up(H, 128)               # each gate = whole 128-lane vregs
    # TODO(synk): for H < 128, pack the 4 gates into a single 128-lane slab to
    # avoid 4x dead-lane MXU/EUP work (kept per-gate slabs for simplicity).

    # Megacore batch split: a leading "parallel" grid axis uses both v7x
    # TensorCores when there are >= two 8-row batch shards.
    n_bsplit = 2 if B >= 16 else 1
    Bp = _round_up(B, 8 * n_bsplit)
    Bsh = Bp // n_bsplit

    CT, vmem_limit = _pick_time_chunk(T, Bsh, E, Hp, max_chunk=time_chunk)
    Tp = _round_up(T, CT)
    n_chunks = Tp // CT
    tail = T - (n_chunks - 1) * CT       # static; == CT when CT divides T

    # --- repack weights to gate-aligned, lane-padded, bf16 layout --------------
    w_ih_g = jnp.pad(w_ih.astype(f32).reshape(4, H, E),
                     ((0, 0), (0, Hp - H), (0, 0)))                      # (4,Hp,E)
    wih_p = jnp.transpose(w_ih_g, (2, 0, 1)).reshape(E, 4 * Hp).astype(bf16)
    w_hh_g = jnp.pad(w_hh.astype(f32).reshape(4, H, H),
                     ((0, 0), (0, Hp - H), (0, Hp - H)))                 # (4,Hp,Hp)
    whh_p = jnp.transpose(w_hh_g, (2, 0, 1)).reshape(Hp, 4 * Hp).astype(bf16)
    bias_p = jnp.pad((b_ih + b_hh).astype(f32).reshape(4, H),
                     ((0, 0), (0, Hp - H))).reshape(1, 4 * Hp)           # f32
    # Zero-padded gate lanes stay exactly 0 through the recurrence
    # (sigmoid(0)=0.5, tanh(0)=0 => c_pad, h_pad stay 0), so padding never leaks.

    emb_p = jnp.pad(embedded.astype(f32),
                    ((0, Tp - T), (0, Bp - B), (0, 0))).astype(bf16)     # (Tp,Bp,E)

    kernel = functools.partial(_lstm_chunk_kernel, chunk=CT, tail=tail, unroll=8)
    out_p, c_last = pl.pallas_call(
        kernel,
        out_shape=(
            jax.ShapeDtypeStruct((Tp, Bp, Hp), f32),
            jax.ShapeDtypeStruct((Bp, Hp), f32),
        ),
        grid_spec=pltpu.PrefetchScalarGridSpec(
            num_scalar_prefetch=0,
            grid=(n_bsplit, n_chunks),
            in_specs=[
                pl.BlockSpec((CT, Bsh, E), lambda b, c: (c, b, 0)),      # emb slab
                pl.BlockSpec((E, 4 * Hp), lambda b, c: (0, 0)),          # W_ih (resident)
                pl.BlockSpec((Hp, 4 * Hp), lambda b, c: (0, 0)),         # W_hh (resident)
                pl.BlockSpec((1, 4 * Hp), lambda b, c: (0, 0)),          # bias (resident)
            ],
            out_specs=[
                pl.BlockSpec((CT, Bsh, Hp), lambda b, c: (c, b, 0)),     # per-step h
                pl.BlockSpec((Bsh, Hp), lambda b, c: (b, 0)),            # final c
            ],
            scratch_shapes=[
                pltpu.VMEM((CT * Bsh, 4 * Hp), f32),   # chunk input projection
                pltpu.VMEM((Bsh, Hp), f32),            # h carry across chunks
                pltpu.VMEM((Bsh, Hp), f32),            # c carry across chunks
            ],
        ),
        compiler_params=pltpu.CompilerParams(
            dimension_semantics=("parallel", "arbitrary"),   # batch || , time seq
            vmem_limit_bytes=vmem_limit),
    )(emb_p, wih_p, whh_p, bias_p)

    out = out_p[:T, :B, :H]
    h_n = out[T - 1][None]               # final hidden aliases the last output row
    c_n = c_last[:B, :H][None]
    return out, (h_n, c_n)


# -----------------------------------------------------------------------------
# AttentionEncoder forward (Embedding -> Dropout(eval) -> LSTM)
# -----------------------------------------------------------------------------
def attention_encoder_forward(x, params, batch_size, *, time_chunk=64):
    """x: (T, B) int32 token ids.  Returns (output, (hidden, cell)) like PyTorch."""
    T = x.shape[0]
    embedded = jnp.take(params["embedding"], x, axis=0)   # (T, B, E) gather glue
    embedded = embedded.reshape(T, batch_size, -1)
    # nn.Dropout is identity in eval mode (deterministic forward).
    # TODO(synk): training-mode dropout (random mask + 1/(1-p) scaling) omitted.
    # TODO(synk): optional — fuse the gather via scalar-prefetched token ids.
    return lstm_pallas(embedded,
                       params["w_ih"], params["w_hh"],
                       params["b_ih"], params["b_hh"],
                       time_chunk=time_chunk)


def init_params(key, input_size, embedding_size, hidden_size):
    k1, k2, k3, k4, k5 = jax.random.split(key, 5)
    scale = 1.0 / jnp.sqrt(hidden_size)
    return {
        "embedding": jax.random.normal(k1, (input_size, embedding_size), jnp.float32),
        "w_ih": jax.random.uniform(k2, (4 * hidden_size, embedding_size),
                                   jnp.float32, -scale, scale),
        "w_hh": jax.random.uniform(k3, (4 * hidden_size, hidden_size),
                                   jnp.float32, -scale, scale),
        "b_ih": jax.random.uniform(k4, (4 * hidden_size,), jnp.float32, -scale, scale),
        "b_hh": jax.random.uniform(k5, (4 * hidden_size,), jnp.float32, -scale, scale),
    }


# Pure-JAX f32 reference (PyTorch nn.LSTM eval semantics) for correctness checks.
def _reference_forward(x, params, batch_size):
    T = x.shape[0]
    emb = jnp.take(params["embedding"], x, axis=0).reshape(T, batch_size, -1)
    H = params["w_hh"].shape[1]
    w_ih_t, w_hh_t = params["w_ih"].T, params["w_hh"].T
    b = params["b_ih"] + params["b_hh"]

    def step(carry, x_t):
        h, c = carry
        gates = x_t @ w_ih_t + h @ w_hh_t + b
        i_g = jax.nn.sigmoid(gates[:, 0 * H:1 * H])
        f_g = jax.nn.sigmoid(gates[:, 1 * H:2 * H])
        g_g = jnp.tanh(gates[:, 2 * H:3 * H])
        o_g = jax.nn.sigmoid(gates[:, 3 * H:4 * H])
        c_new = f_g * c + i_g * g_g
        h_new = o_g * jnp.tanh(c_new)
        return (h_new, c_new), h_new

    h0 = jnp.zeros((batch_size, H), jnp.float32)
    (h_f, c_f), out = lax.scan(step, (h0, h0), emb)
    return out, (h_f[None], c_f[None])


def _check(x, params, batch_size, hidden_size, *, time_chunk=64, tol=5e-2):
    out, (h_n, c_n) = attention_encoder_forward(x, params, batch_size,
                                                time_chunk=time_chunk)
    jax.block_until_ready((out, h_n, c_n))
    T = x.shape[0]
    assert out.shape == (T, batch_size, hidden_size)
    assert h_n.shape == (1, batch_size, hidden_size)
    assert c_n.shape == (1, batch_size, hidden_size)
    ref_out, (ref_h, ref_c) = _reference_forward(x, params, batch_size)
    # bf16 MXU operands (f32 accumulate) -> slightly looser tolerance than pure f32.
    assert jnp.allclose(out, ref_out, atol=tol, rtol=tol), \
        float(jnp.max(jnp.abs(out - ref_out)))
    assert jnp.allclose(h_n, ref_h, atol=tol, rtol=tol)
    assert jnp.allclose(c_n, ref_c, atol=tol, rtol=tol)


if __name__ == "__main__":
    INPUT_SIZE = 16       # vocab
    EMBEDDING_SIZE = 32
    HIDDEN_SIZE = 32

    key = jax.random.PRNGKey(0)
    pkey, xkey1, xkey2 = jax.random.split(key, 3)
    params = init_params(pkey, INPUT_SIZE, EMBEDDING_SIZE, HIDDEN_SIZE)

    # Test 1: T=8, B=4 (single chunk, single batch shard).
    x1 = jax.random.randint(xkey1, (8, 4), 0, INPUT_SIZE, dtype=jnp.int32)
    _check(x1, params, 4, HIDDEN_SIZE)

    # Test 2: T=13, B=16, small chunk -> exercises the tail-chunk epilogue and
    # the two-shard "parallel" batch axis (megacore path on v7x).
    x2 = jax.random.randint(xkey2, (13, 16), 0, INPUT_SIZE, dtype=jnp.int32)
    _check(x2, params, 16, HIDDEN_SIZE, time_chunk=4)

    print("KERNEL_OK")
</pallas_src>

<mosaic_0001>
module attributes {stable_mosaic.version = 11 : i64} {
  func.func @_lstm_chunk_kernel(%arg0: i32, %arg1: i32, %arg2: memref<8x8x32xbf16, #tpu.memory_space<vmem>>, %arg3: memref<32x512xbf16, #tpu.memory_space<vmem>>, %arg4: memref<128x512xbf16, #tpu.memory_space<vmem>>, %arg5: memref<1x512xf32, #tpu.memory_space<vmem>>, %arg6: memref<8x8x128xf32, #tpu.memory_space<vmem>>, %arg7: memref<8x128xf32, #tpu.memory_space<vmem>>, %arg8: memref<64x512xf32, #tpu.memory_space<vmem>>, %arg9: memref<8x128xf32, #tpu.memory_space<vmem>>, %arg10: memref<8x128xf32, #tpu.memory_space<vmem>>) attributes {dimension_semantics = [#tpu.dimension_semantics<parallel>, #tpu.dimension_semantics<arbitrary>], iteration_bounds = array<i64: 1, 1>, scalar_prefetch = 0 : i64, scratch_operands = 3 : i64, tpu.core_type = #tpu.core_type<tc>, window_params = [{transform_indices = @transform_0, window_bounds = array<i64: 8, 8, 32>}, {pipeline_mode = #tpu.pipeline_mode<synchronous>, transform_indices = @transform_1, window_bounds = array<i64: 32, 512>}, {pipeline_mode = #tpu.pipeline_mode<synchronous>, transform_indices = @transform_2, window_bounds = array<i64: 128, 512>}, {pipeline_mode = #tpu.pipeline_mode<synchronous>, transform_indices = @transform_3, window_bounds = array<i64: 1, 512>}, {transform_indices = @transform_4, window_bounds = array<i64: 8, 8, 128>}, {transform_indices = @transform_5, window_bounds = array<i64: 8, 128>}]} {
    %c0_i32 = arith.constant 0 : i32
    %0 = arith.cmpi eq, %arg1, %c0_i32 : i32
    %1 = arith.extui %0 : i1 to i32
    %c0_i32_0 = arith.constant 0 : i32
    %2 = arith.cmpi ne, %1, %c0_i32_0 : i32
    scf.if %2 {
      %cst_134 = arith.constant 0.000000e+00 : f32
      %355 = vector.broadcast %cst_134 : f32 to vector<8x128xf32>
      %c0_135 = arith.constant 0 : index
      %c0_136 = arith.constant 0 : index
      %356 = vector.load %arg9[%c0_135, %c0_136] : memref<8x128xf32, #tpu.memory_space<vmem>>, vector<8x128xf32>
      tpu.vector_store %arg9[%c0_135, %c0_136], %355 {strides = array<i32>} : memref<8x128xf32, #tpu.memory_space<vmem>>, vector<8x128xf32>,
      %cst_137 = arith.constant 0.000000e+00 : f32
      %357 = vector.broadcast %cst_137 : f32 to vector<8x128xf32>
      %c0_138 = arith.constant 0 : index
      %c0_139 = arith.constant 0 : index
      %358 = vector.load %arg10[%c0_138, %c0_139] : memref<8x128xf32, #tpu.memory_space<vmem>>, vector<8x128xf32>
      tpu.vector_store %arg10[%c0_138, %c0_139], %357 {strides = array<i32>} : memref<8x128xf32, #tpu.memory_space<vmem>>, vector<8x128xf32>,
    } else {
    }
    %c0 = arith.constant 0 : index
    %c0_1 = arith.constant 0 : index
    %c0_2 = arith.constant 0 : index
    %3 = vector.load %arg2[%c0, %c0_1, %c0_2] : memref<8x8x32xbf16, #tpu.memory_space<vmem>>, vector<8x8x32xbf16>
    %4 = vector.shape_cast %3 : vector<8x8x32xbf16> to vector<64x32xbf16>
    %c0_3 = arith.constant 0 : index
    %c0_4 = arith.constant 0 : index
    %5 = vector.load %arg3[%c0_3, %c0_4] : memref<32x512xbf16, #tpu.memory_space<vmem>>, vector<32x512xbf16>
    %cst = arith.constant dense<0.000000e+00> : vector<64x512xf32>
    %6 = tpu.matmul %4, %5, %cst {dimension_numbers = #tpu.dot_dimension_numbers<[1], [0], [0], [1], [0, 0, 1, 1], [], []>} : vector<64x32xbf16>, vector<32x512xbf16>, vector<64x512xf32> -> vector<64x512xf32>
    %c0_5 = arith.constant 0 : index
    %c0_6 = arith.constant 0 : index
    %7 = vector.load %arg5[%c0_5, %c0_6] : memref<1x512xf32, #tpu.memory_space<vmem>>, vector<1x512xf32>
    %8 = vector.broadcast %7 : vector<1x512xf32> to vector<64x512xf32>
    %9 = arith.addf %6, %8 : vector<64x512xf32>
    %c0_7 = arith.constant 0 : index
    %c0_8 = arith.constant 0 : index
    %10 = vector.load %arg8[%c0_7, %c0_8] : memref<64x512xf32, #tpu.memory_space<vmem>>, vector<64x512xf32>
    tpu.vector_store %arg8[%c0_7, %c0_8], %9 {strides = array<i32>} : memref<64x512xf32, #tpu.memory_space<vmem>>, vector<64x512xf32>,
    %c0_9 = arith.constant 0 : index
    %c0_10 = arith.constant 0 : index
    %11 = vector.load %arg4[%c0_9, %c0_10] : memref<128x512xbf16, #tpu.memory_space<vmem>>, vector<128x512xbf16>
    %c0_11 = arith.constant 0 : index
    %c0_12 = arith.constant 0 : index
    %12 = vector.load %arg9[%c0_11, %c0_12] : memref<8x128xf32, #tpu.memory_space<vmem>>, vector<8x128xf32>
    %c0_13 = arith.constant 0 : index
    %c0_14 = arith.constant 0 : index
    %13 = vector.load %arg10[%c0_13, %c0_14] : memref<8x128xf32, #tpu.memory_space<vmem>>, vector<8x128xf32>
    %c0_i32_15 = arith.constant 0 : i32
    %c8_i32 = arith.constant 8 : i32
    %14 = arith.muli %c0_i32_15, %c8_i32 : i32
    %15 = tpu.assume_multiple %14, 8 : i32
    %16 = arith.index_cast %15 : i32 to index
    %c0_16 = arith.constant 0 : index
    %17 = vector.load %arg8[%16, %c0_16] : memref<64x512xf32, #tpu.memory_space<vmem>>, vector<8x512xf32>
    %18 = arith.truncf %12 : vector<8x128xf32> to vector<8x128xbf16>
    %cst_17 = arith.constant dense<0.000000e+00> : vector<8x512xf32>
    %19 = tpu.matmul %18, %11, %cst_17 {dimension_numbers = #tpu.dot_dimension_numbers<[1], [0], [0], [1], [0, 0, 1, 1], [], []>} : vector<8x128xbf16>, vector<128x512xbf16>, vector<8x512xf32> -> vector<8x512xf32>
    %20 = arith.addf %17, %19 : vector<8x512xf32>
    %21 = vector.extract_strided_slice %20 {offsets = [0, 0], sizes = [8, 128], strides = [1, 1]} : vector<8x512xf32> to vector<8x128xf32>
    %cst_18 = arith.constant 5.000000e-01 : f32
    %22 = vector.broadcast %cst_18 : f32 to vector<8x128xf32>
    %23 = arith.mulf %22, %21 : vector<8x128xf32>
    %24 = math.tanh %23 : vector<8x128xf32>
    %cst_19 = arith.constant 5.000000e-01 : f32
    %25 = vector.broadcast %cst_19 : f32 to vector<8x128xf32>
    %26 = arith.mulf %25, %24 : vector<8x128xf32>
    %cst_20 = arith.constant 5.000000e-01 : f32
    %27 = vector.broadcast %cst_20 : f32 to vector<8x128xf32>
    %28 = arith.addf %26, %27 : vector<8x128xf32>
    %29 = vector.extract_strided_slice %20 {offsets = [0, 128], sizes = [8, 128], strides = [1, 1]} : vector<8x512xf32> to vector<8x128xf32>
    %cst_21 = arith.constant 5.000000e-01 : f32
    %30 = vector.broadcast %cst_21 : f32 to vector<8x128xf32>
    %31 = arith.mulf %30, %29 : vector<8x128xf32>
    %32 = math.tanh %31 : vector<8x128xf32>
    %cst_22 = arith.constant 5.000000e-01 : f32
    %33 = vector.broadcast %cst_22 : f32 to vector<8x128xf32>
    %34 = arith.mulf %33, %32 : vector<8x128xf32>
    %cst_23 = arith.constant 5.000000e-01 : f32
    %35 = vector.broadcast %cst_23 : f32 to vector<8x128xf32>
    %36 = arith.addf %34, %35 : vector<8x128xf32>
    %37 = vector.extract_strided_slice %20 {offsets = [0, 256], sizes = [8, 128], strides = [1, 1]} : vector<8x512xf32> to vector<8x128xf32>
    %38 = math.tanh %37 : vector<8x128xf32>
    %39 = vector.extract_strided_slice %20 {offsets = [0, 384], sizes = [8, 128], strides = [1, 1]} : vector<8x512xf32> to vector<8x128xf32>
    %cst_24 = arith.constant 5.000000e-01 : f32
    %40 = vector.broadcast %cst_24 : f32 to vector<8x128xf32>
    %41 = arith.mulf %40, %39 : vector<8x128xf32>
    %42 = math.tanh %41 : vector<8x128xf32>
    %cst_25 = arith.constant 5.000000e-01 : f32
    %43 = vector.broadcast %cst_25 : f32 to vector<8x128xf32>
    %44 = arith.mulf %43, %42 : vector<8x128xf32>
    %cst_26 = arith.constant 5.000000e-01 : f32
    %45 = vector.broadcast %cst_26 : f32 to vector<8x128xf32>
    %46 = arith.addf %44, %45 : vector<8x128xf32>
    %47 = arith.mulf %36, %13 : vector<8x128xf32>
    %48 = arith.mulf %28, %38 : vector<8x128xf32>
    %49 = arith.addf %47, %48 : vector<8x128xf32>
    %50 = math.tanh %49 : vector<8x128xf32>
    %51 = arith.mulf %46, %50 : vector<8x128xf32>
    %52 = arith.index_cast %c0_i32_15 : i32 to index
    %c0_27 = arith.constant 0 : index
    %c0_28 = arith.constant 0 : index
    %53 = vector.load %arg6[%52, %c0_27, %c0_28] : memref<8x8x128xf32, #tpu.memory_space<vmem>>, vector<1x8x128xf32>
    %54 = vector.shape_cast %53 : vector<1x8x128xf32> to vector<8x128xf32>
    %55 = vector.shape_cast %51 : vector<8x128xf32> to vector<1x8x128xf32>
    tpu.vector_store %arg6[%52, %c0_27, %c0_28], %55 {strides = array<i32>} : memref<8x8x128xf32, #tpu.memory_space<vmem>>, vector<1x8x128xf32>,
    %c1_i32 = arith.constant 1 : i32
    %c8_i32_29 = arith.constant 8 : i32
    %56 = arith.muli %c1_i32, %c8_i32_29 : i32
    %57 = tpu.assume_multiple %56, 8 : i32
    %58 = arith.index_cast %57 : i32 to index
    %c0_30 = arith.constant 0 : index
    %59 = vector.load %arg8[%58, %c0_30] : memref<64x512xf32, #tpu.memory_space<vmem>>, vector<8x512xf32>
    %60 = arith.truncf %51 : vector<8x128xf32> to vector<8x128xbf16>
    %cst_31 = arith.constant dense<0.000000e+00> : vector<8x512xf32>
    %61 = tpu.matmul %60, %11, %cst_31 {dimension_numbers = #tpu.dot_dimension_numbers<[1], [0], [0], [1], [0, 0, 1, 1], [], []>} : vector<8x128xbf16>, vector<128x512xbf16>, vector<8x512xf32> -> vector<8x512xf32>
    %62 = arith.addf %59, %61 : vector<8x512xf32>
    %63 = vector.extract_strided_slice %62 {offsets = [0, 0], sizes = [8, 128], strides = [1, 1]} : vector<8x512xf32> to vector<8x128xf32>
    %cst_32 = arith.constant 5.000000e-01 : f32
    %64 = vector.broadcast %cst_32 : f32 to vector<8x128xf32>
    %65 = arith.mulf %64, %63 : vector<8x128xf32>
    %66 = math.tanh %65 : vector<8x128xf32>
    %cst_33 = arith.constant 5.000000e-01 : f32
    %67 = vector.broadcast %cst_33 : f32 to vector<8x128xf32>
    %68 = arith.mulf %67, %66 : vector<8x128xf32>
    %cst_34 = arith.constant 5.000000e-01 : f32
    %69 = vector.broadcast %cst_34 : f32 to vector<8x128xf32>
    %70 = arith.addf %68, %69 : vector<8x128xf32>
    %71 = vector.extract_strided_slice %62 {offsets = [0, 128], sizes = [8, 128], strides = [1, 1]} : vector<8x512xf32> to vector<8x128xf32>
    %cst_35 = arith.constant 5.000000e-01 : f32
    %72 = vector.broadcast %cst_35 : f32 to vector<8x128xf32>
    %73 = arith.mulf %72, %71 : vector<8x128xf32>
    %74 = math.tanh %73 : vector<8x128xf32>
    %cst_36 = arith.constant 5.000000e-01 : f32
    %75 = vector.broadcast %cst_36 : f32 to vector<8x128xf32>
    %76 = arith.mulf %75, %74 : vector<8x128xf32>
    %cst_37 = arith.constant 5.000000e-01 : f32
    %77 = vector.broadcast %cst_37 : f32 to vector<8x128xf32>
    %78 = arith.addf %76, %77 : vector<8x128xf32>
    %79 = vector.extract_strided_slice %62 {offsets = [0, 256], sizes = [8, 128], strides = [1, 1]} : vector<8x512xf32> to vector<8x128xf32>
    %80 = math.tanh %79 : vector<8x128xf32>
    %81 = vector.extract_strided_slice %62 {offsets = [0, 384], sizes = [8, 128], strides = [1, 1]} : vector<8x512xf32> to vector<8x128xf32>
    %cst_38 = arith.constant 5.000000e-01 : f32
    %82 = vector.broadcast %cst_38 : f32 to vector<8x128xf32>
    %83 = arith.mulf %82, %81 : vector<8x128xf32>
    %84 = math.tanh %83 : vector<8x128xf32>
    %cst_39 = arith.constant 5.000000e-01 : f32
    %85 = vector.broadcast %cst_39 : f32 to vector<8x128xf32>
    %86 = arith.mulf %85, %84 : vector<8x128xf32>
    %cst_40 = arith.constant 5.000000e-01 : f32
    %87 = vector.broadcast %cst_40 : f32 to vector<8x128xf32>
    %88 = arith.addf %86, %87 : vector<8x128xf32>
    %89 = arith.mulf %78, %49 : vector<8x128xf32>
    %90 = arith.mulf %70, %80 : vector<8x128xf32>
    %91 = arith.addf %89, %90 : vector<8x128xf32>
    %92 = math.tanh %91 : vector<8x128xf32>
    %93 = arith.mulf %88, %92 : vector<8x128xf32>
    %94 = arith.index_cast %c1_i32 : i32 to index
    %c0_41 = arith.constant 0 : index
    %c0_42 = arith.constant 0 : index
    %95 = vector.load %arg6[%94, %c0_41, %c0_42] : memref<8x8x128xf32, #tpu.memory_space<vmem>>, vector<1x8x128xf32>
    %96 = vector.shape_cast %95 : vector<1x8x128xf32> to vector<8x128xf32>
    %97 = vector.shape_cast %93 : vector<8x128xf32> to vector<1x8x128xf32>
    tpu.vector_store %arg6[%94, %c0_41, %c0_42], %97 {strides = array<i32>} : memref<8x8x128xf32, #tpu.memory_space<vmem>>, vector<1x8x128xf32>,
    %c2_i32 = arith.constant 2 : i32
    %c8_i32_43 = arith.constant 8 : i32
    %98 = arith.muli %c2_i32, %c8_i32_43 : i32
    %99 = tpu.assume_multiple %98, 8 : i32
    %100 = arith.index_cast %99 : i32 to index
    %c0_44 = arith.constant 0 : index
    %101 = vector.load %arg8[%100, %c0_44] : memref<64x512xf32, #tpu.memory_space<vmem>>, vector<8x512xf32>
    %102 = arith.truncf %93 : vector<8x128xf32> to vector<8x128xbf16>
    %cst_45 = arith.constant dense<0.000000e+00> : vector<8x512xf32>
    %103 = tpu.matmul %102, %11, %cst_45 {dimension_numbers = #tpu.dot_dimension_numbers<[1], [0], [0], [1], [0, 0, 1, 1], [], []>} : vector<8x128xbf16>, vector<128x512xbf16>, vector<8x512xf32> -> vector<8x512xf32>
    %104 = arith.addf %101, %103 : vector<8x512xf32>
    %105 = vector.extract_strided_slice %104 {offsets = [0, 0], sizes = [8, 128], strides = [1, 1]} : vector<8x512xf32> to vector<8x128xf32>
    %cst_46 = arith.constant 5.000000e-01 : f32
    %106 = vector.broadcast %cst_46 : f32 to vector<8x128xf32>
    %107 = arith.mulf %106, %105 : vector<8x128xf32>
    %108 = math.tanh %107 : vector<8x128xf32>
    %cst_47 = arith.constant 5.000000e-01 : f32
    %109 = vector.broadcast %cst_47 : f32 to vector<8x128xf32>
    %110 = arith.mulf %109, %108 : vector<8x128xf32>
    %cst_48 = arith.constant 5.000000e-01 : f32
    %111 = vector.broadcast %cst_48 : f32 to vector<8x128xf32>
    %112 = arith.addf %110, %111 : vector<8x128xf32>
    %113 = vector.extract_strided_slice %104 {offsets = [0, 128], sizes = [8, 128], strides = [1, 1]} : vector<8x512xf32> to vector<8x128xf32>
    %cst_49 = arith.constant 5.000000e-01 : f32
    %114 = vector.broadcast %cst_49 : f32 to vector<8x128xf32>
    %115 = arith.mulf %114, %113 : vector<8x128xf32>
    %116 = math.tanh %115 : vector<8x128xf32>
    %cst_50 = arith.constant 5.000000e-01 : f32
    %117 = vector.broadcast %cst_50 : f32 to vector<8x128xf32>
    %118 = arith.mulf %117, %116 : vector<8x128xf32>
    %cst_51 = arith.constant 5.000000e-01 : f32
    %119 = vector.broadcast %cst_51 : f32 to vector<8x128xf32>
    %120 = arith.addf %118, %119 : vector<8x128xf32>
    %121 = vector.extract_strided_slice %104 {offsets = [0, 256], sizes = [8, 128], strides = [1, 1]} : vector<8x512xf32> to vector<8x128xf32>
    %122 = math.tanh %121 : vector<8x128xf32>
    %123 = vector.extract_strided_slice %104 {offsets = [0, 384], sizes = [8, 128], strides = [1, 1]} : vector<8x512xf32> to vector<8x128xf32>
    %cst_52 = arith.constant 5.000000e-01 : f32
    %124 = vector.broadcast %cst_52 : f32 to vector<8x128xf32>
    %125 = arith.mulf %124, %123 : vector<8x128xf32>
    %126 = math.tanh %125 : vector<8x128xf32>
    %cst_53 = arith.constant 5.000000e-01 : f32
    %127 = vector.broadcast %cst_53 : f32 to vector<8x128xf32>
    %128 = arith.mulf %127, %126 : vector<8x128xf32>
    %cst_54 = arith.constant 5.000000e-01 : f32
    %129 = vector.broadcast %cst_54 : f32 to vector<8x128xf32>
    %130 = arith.addf %128, %129 : vector<8x128xf32>
    %131 = arith.mulf %120, %91 : vector<8x128xf32>
    %132 = arith.mulf %112, %122 : vector<8x128xf32>
    %133 = arith.addf %131, %132 : vector<8x128xf32>
    %134 = math.tanh %133 : vector<8x128xf32>
    %135 = arith.mulf %130, %134 : vector<8x128xf32>
    %136 = arith.index_cast %c2_i32 : i32 to index
    %c0_55 = arith.constant 0 : index
    %c0_56 = arith.constant 0 : index
    %137 = vector.load %arg6[%136, %c0_55, %c0_56] : memref<8x8x128xf32, #tpu.memory_space<vmem>>, vector<1x8x128xf32>
    %138 = vector.shape_cast %137 : vector<1x8x128xf32> to vector<8x128xf32>
    %139 = vector.shape_cast %135 : vector<8x128xf32> to vector<1x8x128xf32>
    tpu.vector_store %arg6[%136, %c0_55, %c0_56], %139 {strides = array<i32>} : memref<8x8x128xf32, #tpu.memory_space<vmem>>, vector<1x8x128xf32>,
    %c3_i32 = arith.constant 3 : i32
    %c8_i32_57 = arith.constant 8 : i32
    %140 = arith.muli %c3_i32, %c8_i32_57 : i32
    %141 = tpu.assume_multiple %140, 8 : i32
    %142 = arith.index_cast %141 : i32 to index
    %c0_58 = arith.constant 0 : index
    %143 = vector.load %arg8[%142, %c0_58] : memref<64x512xf32, #tpu.memory_space<vmem>>, vector<8x512xf32>
    %144 = arith.truncf %135 : vector<8x128xf32> to vector<8x128xbf16>
    %cst_59 = arith.constant dense<0.000000e+00> : vector<8x512xf32>
    %145 = tpu.matmul %144, %11, %cst_59 {dimension_numbers = #tpu.dot_dimension_numbers<[1], [0], [0], [1], [0, 0, 1, 1], [], []>} : vector<8x128xbf16>, vector<128x512xbf16>, vector<8x512xf32> -> vector<8x512xf32>
    %146 = arith.addf %143, %145 : vector<8x512xf32>
    %147 = vector.extract_strided_slice %146 {offsets = [0, 0], sizes = [8, 128], strides = [1, 1]} : vector<8x512xf32> to vector<8x128xf32>
    %cst_60 = arith.constant 5.000000e-01 : f32
    %148 = vector.broadcast %cst_60 : f32 to vector<8x128xf32>
    %149 = arith.mulf %148, %147 : vector<8x128xf32>
    %150 = math.tanh %149 : vector<8x128xf32>
    %cst_61 = arith.constant 5.000000e-01 : f32
    %151 = vector.broadcast %cst_61 : f32 to vector<8x128xf32>
    %152 = arith.mulf %151, %150 : vector<8x128xf32>
    %cst_62 = arith.constant 5.000000e-01 : f32
    %153 = vector.broadcast %cst_62 : f32 to vector<8x128xf32>
    %154 = arith.addf %152, %153 : vector<8x128xf32>
    %155 = vector.extract_strided_slice %146 {offsets = [0, 128], sizes = [8, 128], strides = [1, 1]} : vector<8x512xf32> to vector<8x128xf32>
    %cst_63 = arith.constant 5.000000e-01 : f32
    %156 = vector.broadcast %cst_63 : f32 to vector<8x128xf32>
    %157 = arith.mulf %156, %155 : vector<8x128xf32>
    %158 = math.tanh %157 : vector<8x128xf32>
    %cst_64 = arith.constant 5.000000e-01 : f32
    %159 = vector.broadcast %cst_64 : f32 to vector<8x128xf32>
    %160 = arith.mulf %159, %158 : vector<8x128xf32>
    %cst_65 = arith.constant 5.000000e-01 : f32
    %161 = vector.broadcast %cst_65 : f32 to vector<8x128xf32>
    %162 = arith.addf %160, %161 : vector<8x128xf32>
    %163 = vector.extract_strided_slice %146 {offsets = [0, 256], sizes = [8, 128], strides = [1, 1]} : vector<8x512xf32> to vector<8x128xf32>
    %164 = math.tanh %163 : vector<8x128xf32>
    %165 = vector.extract_strided_slice %146 {offsets = [0, 384], sizes = [8, 128], strides = [1, 1]} : vector<8x512xf32> to vector<8x128xf32>
    %cst_66 = arith.constant 5.000000e-01 : f32
    %166 = vector.broadcast %cst_66 : f32 to vector<8x128xf32>
    %167 = arith.mulf %166, %165 : vector<8x128xf32>
    %168 = math.tanh %167 : vector<8x128xf32>
    %cst_67 = arith.constant 5.000000e-01 : f32
    %169 = vector.broadcast %cst_67 : f32 to vector<8x128xf32>
    %170 = arith.mulf %169, %168 : vector<8x128xf32>
    %cst_68 = arith.constant 5.000000e-01 : f32
    %171 = vector.broadcast %cst_68 : f32 to vector<8x128xf32>
    %172 = arith.addf %170, %171 : vector<8x128xf32>
    %173 = arith.mulf %162, %133 : vector<8x128xf32>
    %174 = arith.mulf %154, %164 : vector<8x128xf32>
    %175 = arith.addf %173, %174 : vector<8x128xf32>
    %176 = math.tanh %175 : vector<8x128xf32>
    %177 = arith.mulf %172, %176 : vector<8x128xf32>
    %178 = arith.index_cast %c3_i32 : i32 to index
    %c0_69 = arith.constant 0 : index
    %c0_70 = arith.constant 0 : index
    %179 = vector.load %arg6[%178, %c0_69, %c0_70] : memref<8x8x128xf32, #tpu.memory_space<vmem>>, vector<1x8x128xf32>
    %180 = vector.shape_cast %179 : vector<1x8x128xf32> to vector<8x128xf32>
    %181 = vector.shape_cast %177 : vector<8x128xf32> to vector<1x8x128xf32>
    tpu.vector_store %arg6[%178, %c0_69, %c0_70], %181 {strides = array<i32>} : memref<8x8x128xf32, #tpu.memory_space<vmem>>, vector<1x8x128xf32>,
    %c4_i32 = arith.constant 4 : i32
    %c8_i32_71 = arith.constant 8 : i32
    %182 = arith.muli %c4_i32, %c8_i32_71 : i32
    %183 = tpu.assume_multiple %182, 8 : i32
    %184 = arith.index_cast %183 : i32 to index
    %c0_72 = arith.constant 0 : index
    %185 = vector.load %arg8[%184, %c0_72] : memref<64x512xf32, #tpu.memory_space<vmem>>, vector<8x512xf32>
    %186 = arith.truncf %177 : vector<8x128xf32> to vector<8x128xbf16>
    %cst_73 = arith.constant dense<0.000000e+00> : vector<8x512xf32>
    %187 = tpu.matmul %186, %11, %cst_73 {dimension_numbers = #tpu.dot_dimension_numbers<[1], [0], [0], [1], [0, 0, 1, 1], [], []>} : vector<8x128xbf16>, vector<128x512xbf16>, vector<8x512xf32> -> vector<8x512xf32>
    %188 = arith.addf %185, %187 : vector<8x512xf32>
    %189 = vector.extract_strided_slice %188 {offsets = [0, 0], sizes = [8, 128], strides = [1, 1]} : vector<8x512xf32> to vector<8x128xf32>
    %cst_74 = arith.constant 5.000000e-01 : f32
    %190 = vector.broadcast %cst_74 : f32 to vector<8x128xf32>
    %191 = arith.mulf %190, %189 : vector<8x128xf32>
    %192 = math.tanh %191 : vector<8x128xf32>
    %cst_75 = arith.constant 5.000000e-01 : f32
    %193 = vector.broadcast %cst_75 : f32 to vector<8x128xf32>
    %194 = arith.mulf %193, %192 : vector<8x128xf32>
    %cst_76 = arith.constant 5.000000e-01 : f32
    %195 = vector.broadcast %cst_76 : f32 to vector<8x128xf32>
    %196 = arith.addf %194, %195 : vector<8x128xf32>
    %197 = vector.extract_strided_slice %188 {offsets = [0, 128], sizes = [8, 128], strides = [1, 1]} : vector<8x512xf32> to vector<8x128xf32>
    %cst_77 = arith.constant 5.000000e-01 : f32
    %198 = vector.broadcast %cst_77 : f32 to vector<8x128xf32>
    %199 = arith.mulf %198, %197 : vector<8x128xf32>
    %200 = math.tanh %199 : vector<8x128xf32>
    %cst_78 = arith.constant 5.000000e-01 : f32
    %201 = vector.broadcast %cst_78 : f32 to vector<8x128xf32>
    %202 = arith.mulf %201, %200 : vector<8x128xf32>
    %cst_79 = arith.constant 5.000000e-01 : f32
    %203 = vector.broadcast %cst_79 : f32 to vector<8x128xf32>
    %204 = arith.addf %202, %203 : vector<8x128xf32>
    %205 = vector.extract_strided_slice %188 {offsets = [0, 256], sizes = [8, 128], strides = [1, 1]} : vector<8x512xf32> to vector<8x128xf32>
    %206 = math.tanh %205 : vector<8x128xf32>
    %207 = vector.extract_strided_slice %188 {offsets = [0, 384], sizes = [8, 128], strides = [1, 1]} : vector<8x512xf32> to vector<8x128xf32>
    %cst_80 = arith.constant 5.000000e-01 : f32
    %208 = vector.broadcast %cst_80 : f32 to vector<8x128xf32>
    %209 = arith.mulf %208, %207 : vector<8x128xf32>
    %210 = math.tanh %209 : vector<8x128xf32>
    %cst_81 = arith.constant 5.000000e-01 : f32
    %211 = vector.broadcast %cst_81 : f32 to vector<8x128xf32>
    %212 = arith.mulf %211, %210 : vector<8x128xf32>
    %cst_82 = arith.constant 5.000000e-01 : f32
    %213 = vector.broadcast %cst_82 : f32 to vector<8x128xf32>
    %214 = arith.addf %212, %213 : vector<8x128xf32>
    %215 = arith.mulf %204, %175 : vector<8x128xf32>
    %216 = arith.mulf %196, %206 : vector<8x128xf32>
    %217 = arith.addf %215, %216 : vector<8x128xf32>
    %218 = math.tanh %217 : vector<8x128xf32>
    %219 = arith.mulf %214, %218 : vector<8x128xf32>
    %220 = arith.index_cast %c4_i32 : i32 to index
    %c0_83 = arith.constant 0 : index
    %c0_84 = arith.constant 0 : index
    %221 = vector.load %arg6[%220, %c0_83, %c0_84] : memref<8x8x128xf32, #tpu.memory_space<vmem>>, vector<1x8x128xf32>
    %222 = vector.shape_cast %221 : vector<1x8x128xf32> to vector<8x128xf32>
    %223 = vector.shape_cast %219 : vector<8x128xf32> to vector<1x8x128xf32>
    tpu.vector_store %arg6[%220, %c0_83, %c0_84], %223 {strides = array<i32>} : memref<8x8x128xf32, #tpu.memory_space<vmem>>, vector<1x8x128xf32>,
    %c5_i32 = arith.constant 5 : i32
    %c8_i32_85 = arith.constant 8 : i32
    %224 = arith.muli %c5_i32, %c8_i32_85 : i32
    %225 = tpu.assume_multiple %224, 8 : i32
    %226 = arith.index_cast %225 : i32 to index
    %c0_86 = arith.constant 0 : index
    %227 = vector.load %arg8[%226, %c0_86] : memref<64x512xf32, #tpu.memory_space<vmem>>, vector<8x512xf32>
    %228 = arith.truncf %219 : vector<8x128xf32> to vector<8x128xbf16>
    %cst_87 = arith.constant dense<0.000000e+00> : vector<8x512xf32>
    %229 = tpu.matmul %228, %11, %cst_87 {dimension_numbers = #tpu.dot_dimension_numbers<[1], [0], [0], [1], [0, 0, 1, 1], [], []>} : vector<8x128xbf16>, vector<128x512xbf16>, vector<8x512xf32> -> vector<8x512xf32>
    %230 = arith.addf %227, %229 : vector<8x512xf32>
    %231 = vector.extract_strided_slice %230 {offsets = [0, 0], sizes = [8, 128], strides = [1, 1]} : vector<8x512xf32> to vector<8x128xf32>
    %cst_88 = arith.constant 5.000000e-01 : f32
    %232 = vector.broadcast %cst_88 : f32 to vector<8x128xf32>
    %233 = arith.mulf %232, %231 : vector<8x128xf32>
    %234 = math.tanh %233 : vector<8x128xf32>
    %cst_89 = arith.constant 5.000000e-01 : f32
    %235 = vector.broadcast %cst_89 : f32 to vector<8x128xf32>
    %236 = arith.mulf %235, %234 : vector<8x128xf32>
    %cst_90 = arith.constant 5.000000e-01 : f32
    %237 = vector.broadcast %cst_90 : f32 to vector<8x128xf32>
    %238 = arith.addf %236, %237 : vector<8x128xf32>
    %239 = vector.extract_strided_slice %230 {offsets = [0, 128], sizes = [8, 128], strides = [1, 1]} : vector<8x512xf32> to vector<8x128xf32>
    %cst_91 = arith.constant 5.000000e-01 : f32
    %240 = vector.broadcast %cst_91 : f32 to vector<8x128xf32>
    %241 = arith.mulf %240, %239 : vector<8x128xf32>
    %242 = math.tanh %241 : vector<8x128xf32>
    %cst_92 = arith.constant 5.000000e-01 : f32
    %243 = vector.broadcast %cst_92 : f32 to vector<8x128xf32>
    %244 = arith.mulf %243, %242 : vector<8x128xf32>
    %cst_93 = arith.constant 5.000000e-01 : f32
    %245 = vector.broadcast %cst_93 : f32 to vector<8x128xf32>
    %246 = arith.addf %244, %245 : vector<8x128xf32>
    %247 = vector.extract_strided_slice %230 {offsets = [0, 256], sizes = [8, 128], strides = [1, 1]} : vector<8x512xf32> to vector<8x128xf32>
    %248 = math.tanh %247 : vector<8x128xf32>
    %249 = vector.extract_strided_slice %230 {offsets = [0, 384], sizes = [8, 128], strides = [1, 1]} : vector<8x512xf32> to vector<8x128xf32>
    %cst_94 = arith.constant 5.000000e-01 : f32
    %250 = vector.broadcast %cst_94 : f32 to vector<8x128xf32>
    %251 = arith.mulf %250, %249 : vector<8x128xf32>
    %252 = math.tanh %251 : vector<8x128xf32>
    %cst_95 = arith.constant 5.000000e-01 : f32
    %253 = vector.broadcast %cst_95 : f32 to vector<8x128xf32>
    %254 = arith.mulf %253, %252 : vector<8x128xf32>
    %cst_96 = arith.constant 5.000000e-01 : f32
    %255 = vector.broadcast %cst_96 : f32 to vector<8x128xf32>
    %256 = arith.addf %254, %255 : vector<8x128xf32>
    %257 = arith.mulf %246, %217 : vector<8x128xf32>
    %258 = arith.mulf %238, %248 : vector<8x128xf32>
    %259 = arith.addf %257, %258 : vector<8x128xf32>
    %260 = math.tanh %259 : vector<8x128xf32>
    %261 = arith.mulf %256, %260 : vector<8x128xf32>
    %262 = arith.index_cast %c5_i32 : i32 to index
    %c0_97 = arith.constant 0 : index
    %c0_98 = arith.constant 0 : index
    %263 = vector.load %arg6[%262, %c0_97, %c0_98] : memref<8x8x128xf32, #tpu.memory_space<vmem>>, vector<1x8x128xf32>
    %264 = vector.shape_cast %263 : vector<1x8x128xf32> to vector<8x128xf32>
    %265 = vector.shape_cast %261 : vector<8x128xf32> to vector<1x8x128xf32>
    tpu.vector_store %arg6[%262, %c0_97, %c0_98], %265 {strides = array<i32>} : memref<8x8x128xf32, #tpu.memory_space<vmem>>, vector<1x8x128xf32>,
    %c6_i32 = arith.constant 6 : i32
    %c8_i32_99 = arith.constant 8 : i32
    %266 = arith.muli %c6_i32, %c8_i32_99 : i32
    %267 = tpu.assume_multiple %266, 8 : i32
    %268 = arith.index_cast %267 : i32 to index
    %c0_100 = arith.constant 0 : index
    %269 = vector.load %arg8[%268, %c0_100] : memref<64x512xf32, #tpu.memory_space<vmem>>, vector<8x512xf32>
    %270 = arith.truncf %261 : vector<8x128xf32> to vector<8x128xbf16>
    %cst_101 = arith.constant dense<0.000000e+00> : vector<8x512xf32>
    %271 = tpu.matmul %270, %11, %cst_101 {dimension_numbers = #tpu.dot_dimension_numbers<[1], [0], [0], [1], [0, 0, 1, 1], [], []>} : vector<8x128xbf16>, vector<128x512xbf16>, vector<8x512xf32> -> vector<8x512xf32>
    %272 = arith.addf %269, %271 : vector<8x512xf32>
    %273 = vector.extract_strided_slice %272 {offsets = [0, 0], sizes = [8, 128], strides = [1, 1]} : vector<8x512xf32> to vector<8x128xf32>
    %cst_102 = arith.constant 5.000000e-01 : f32
    %274 = vector.broadcast %cst_102 : f32 to vector<8x128xf32>
    %275 = arith.mulf %274, %273 : vector<8x128xf32>
    %276 = math.tanh %275 : vector<8x128xf32>
    %cst_103 = arith.constant 5.000000e-01 : f32
    %277 = vector.broadcast %cst_103 : f32 to vector<8x128xf32>
    %278 = arith.mulf %277, %276 : vector<8x128xf32>
    %cst_104 = arith.constant 5.000000e-01 : f32
    %279 = vector.broadcast %cst_104 : f32 to vector<8x128xf32>
    %280 = arith.addf %278, %279 : vector<8x128xf32>
    %281 = vector.extract_strided_slice %272 {offsets = [0, 128], sizes = [8, 128], strides = [1, 1]} : vector<8x512xf32> to vector<8x128xf32>
    %cst_105 = arith.constant 5.000000e-01 : f32
    %282 = vector.broadcast %cst_105 : f32 to vector<8x128xf32>
    %283 = arith.mulf %282, %281 : vector<8x128xf32>
    %284 = math.tanh %283 : vector<8x128xf32>
    %cst_106 = arith.constant 5.000000e-01 : f32
    %285 = vector.broadcast %cst_106 : f32 to vector<8x128xf32>
    %286 = arith.mulf %285, %284 : vector<8x128xf32>
    %cst_107 = arith.constant 5.000000e-01 : f32
    %287 = vector.broadcast %cst_107 : f32 to vector<8x128xf32>
    %288 = arith.addf %286, %287 : vector<8x128xf32>
    %289 = vector.extract_strided_slice %272 {offsets = [0, 256], sizes = [8, 128], strides = [1, 1]} : vector<8x512xf32> to vector<8x128xf32>
    %290 = math.tanh %289 : vector<8x128xf32>
    %291 = vector.extract_strided_slice %272 {offsets = [0, 384], sizes = [8, 128], strides = [1, 1]} : vector<8x512xf32> to vector<8x128xf32>
    %cst_108 = arith.constant 5.000000e-01 : f32
    %292 = vector.broadcast %cst_108 : f32 to vector<8x128xf32>
    %293 = arith.mulf %292, %291 : vector<8x128xf32>
    %294 = math.tanh %293 : vector<8x128xf32>
    %cst_109 = arith.constant 5.000000e-01 : f32
    %295 = vector.broadcast %cst_109 : f32 to vector<8x128xf32>
    %296 = arith.mulf %295, %294 : vector<8x128xf32>
    %cst_110 = arith.constant 5.000000e-01 : f32
    %297 = vector.broadcast %cst_110 : f32 to vector<8x128xf32>
    %298 = arith.addf %296, %297 : vector<8x128xf32>
    %299 = arith.mulf %288, %259 : vector<8x128xf32>
    %300 = arith.mulf %280, %290 : vector<8x128xf32>
    %301 = arith.addf %299, %300 : vector<8x128xf32>
    %302 = math.tanh %301 : vector<8x128xf32>
    %303 = arith.mulf %298, %302 : vector<8x128xf32>
    %304 = arith.index_cast %c6_i32 : i32 to index
    %c0_111 = arith.constant 0 : index
    %c0_112 = arith.constant 0 : index
    %305 = vector.load %arg6[%304, %c0_111, %c0_112] : memref<8x8x128xf32, #tpu.memory_space<vmem>>, vector<1x8x128xf32>
    %306 = vector.shape_cast %305 : vector<1x8x128xf32> to vector<8x128xf32>
    %307 = vector.shape_cast %303 : vector<8x128xf32> to vector<1x8x128xf32>
    tpu.vector_store %arg6[%304, %c0_111, %c0_112], %307 {strides = array<i32>} : memref<8x8x128xf32, #tpu.memory_space<vmem>>, vector<1x8x128xf32>,
    %c7_i32 = arith.constant 7 : i32
    %c8_i32_113 = arith.constant 8 : i32
    %308 = arith.muli %c7_i32, %c8_i32_113 : i32
    %309 = tpu.assume_multiple %308, 8 : i32
    %310 = arith.index_cast %309 : i32 to index
    %c0_114 = arith.constant 0 : index
    %311 = vector.load %arg8[%310, %c0_114] : memref<64x512xf32, #tpu.memory_space<vmem>>, vector<8x512xf32>
    %312 = arith.truncf %303 : vector<8x128xf32> to vector<8x128xbf16>
    %cst_115 = arith.constant dense<0.000000e+00> : vector<8x512xf32>
    %313 = tpu.matmul %312, %11, %cst_115 {dimension_numbers = #tpu.dot_dimension_numbers<[1], [0], [0], [1], [0, 0, 1, 1], [], []>} : vector<8x128xbf16>, vector<128x512xbf16>, vector<8x512xf32> -> vector<8x512xf32>
    %314 = arith.addf %311, %313 : vector<8x512xf32>
    %315 = vector.extract_strided_slice %314 {offsets = [0, 0], sizes = [8, 128], strides = [1, 1]} : vector<8x512xf32> to vector<8x128xf32>
    %cst_116 = arith.constant 5.000000e-01 : f32
    %316 = vector.broadcast %cst_116 : f32 to vector<8x128xf32>
    %317 = arith.mulf %316, %315 : vector<8x128xf32>
    %318 = math.tanh %317 : vector<8x128xf32>
    %cst_117 = arith.constant 5.000000e-01 : f32
    %319 = vector.broadcast %cst_117 : f32 to vector<8x128xf32>
    %320 = arith.mulf %319, %318 : vector<8x128xf32>
    %cst_118 = arith.constant 5.000000e-01 : f32
    %321 = vector.broadcast %cst_118 : f32 to vector<8x128xf32>
    %322 = arith.addf %320, %321 : vector<8x128xf32>
    %323 = vector.extract_strided_slice %314 {offsets = [0, 128], sizes = [8, 128], strides = [1, 1]} : vector<8x512xf32> to vector<8x128xf32>
    %cst_119 = arith.constant 5.000000e-01 : f32
    %324 = vector.broadcast %cst_119 : f32 to vector<8x128xf32>
    %325 = arith.mulf %324, %323 : vector<8x128xf32>
    %326 = math.tanh %325 : vector<8x128xf32>
    %cst_120 = arith.constant 5.000000e-01 : f32
    %327 = vector.broadcast %cst_120 : f32 to vector<8x128xf32>
    %328 = arith.mulf %327, %326 : vector<8x128xf32>
    %cst_121 = arith.constant 5.000000e-01 : f32
    %329 = vector.broadcast %cst_121 : f32 to vector<8x128xf32>
    %330 = arith.addf %328, %329 : vector<8x128xf32>
    %331 = vector.extract_strided_slice %314 {offsets = [0, 256], sizes = [8, 128], strides = [1, 1]} : vector<8x512xf32> to vector<8x128xf32>
    %332 = math.tanh %331 : vector<8x128xf32>
    %333 = vector.extract_strided_slice %314 {offsets = [0, 384], sizes = [8, 128], strides = [1, 1]} : vector<8x512xf32> to vector<8x128xf32>
    %cst_122 = arith.constant 5.000000e-01 : f32
    %334 = vector.broadcast %cst_122 : f32 to vector<8x128xf32>
    %335 = arith.mulf %334, %333 : vector<8x128xf32>
    %336 = math.tanh %335 : vector<8x128xf32>
    %cst_123 = arith.constant 5.000000e-01 : f32
    %337 = vector.broadcast %cst_123 : f32 to vector<8x128xf32>
    %338 = arith.mulf %337, %336 : vector<8x128xf32>
    %cst_124 = arith.constant 5.000000e-01 : f32
    %339 = vector.broadcast %cst_124 : f32 to vector<8x128xf32>
    %340 = arith.addf %338, %339 : vector<8x128xf32>
    %341 = arith.mulf %330, %301 : vector<8x128xf32>
    %342 = arith.mulf %322, %332 : vector<8x128xf32>
    %343 = arith.addf %341, %342 : vector<8x128xf32>
    %344 = math.tanh %343 : vector<8x128xf32>
    %345 = arith.mulf %340, %344 : vector<8x128xf32>
    %346 = arith.index_cast %c7_i32 : i32 to index
    %c0_125 = arith.constant 0 : index
    %c0_126 = arith.constant 0 : index
    %347 = vector.load %arg6[%346, %c0_125, %c0_126] : memref<8x8x128xf32, #tpu.memory_space<vmem>>, vector<1x8x128xf32>
    %348 = vector.shape_cast %347 : vector<1x8x128xf32> to vector<8x128xf32>
    %349 = vector.shape_cast %345 : vector<8x128xf32> to vector<1x8x128xf32>
    tpu.vector_store %arg6[%346, %c0_125, %c0_126], %349 {strides = array<i32>} : memref<8x8x128xf32, #tpu.memory_space<vmem>>, vector<1x8x128xf32>,
    %c8_i32_127 = arith.constant 8 : i32
    %c0_128 = arith.constant 0 : index
    %c0_129 = arith.constant 0 : index
    %350 = vector.load %arg9[%c0_128, %c0_129] : memref<8x128xf32, #tpu.memory_space<vmem>>, vector<8x128xf32>
    tpu.vector_store %arg9[%c0_128, %c0_129], %345 {strides = array<i32>} : memref<8x128xf32, #tpu.memory_space<vmem>>, vector<8x128xf32>,
    %c0_130 = arith.constant 0 : index
    %c0_131 = arith.constant 0 : index
    %351 = vector.load %arg10[%c0_130, %c0_131] : memref<8x128xf32, #tpu.memory_space<vmem>>, vector<8x128xf32>
    tpu.vector_store %arg10[%c0_130, %c0_131], %343 {strides = array<i32>} : memref<8x128xf32, #tpu.memory_space<vmem>>, vector<8x128xf32>,
    %c0_i32_132 = arith.constant 0 : i32
    %352 = arith.cmpi eq, %arg1, %c0_i32_132 : i32
    %353 = arith.extui %352 : i1 to i32
    %c0_i32_133 = arith.constant 0 : i32
    %354 = arith.cmpi ne, %353, %c0_i32_133 : i32
    scf.if %354 {
      %c0_134 = arith.constant 0 : index
      %c0_135 = arith.constant 0 : index
      %355 = vector.load %arg10[%c0_134, %c0_135] : memref<8x128xf32, #tpu.memory_space<vmem>>, vector<8x128xf32>
      %c0_136 = arith.constant 0 : index
      %c0_137 = arith.constant 0 : index
      %356 = vector.load %arg7[%c0_136, %c0_137] : memref<8x128xf32, #tpu.memory_space<vmem>>, vector<8x128xf32>
      tpu.vector_store %arg7[%c0_136, %c0_137], %355 {strides = array<i32>} : memref<8x128xf32, #tpu.memory_space<vmem>>, vector<8x128xf32>,
    } else {
    }
    return
  }
  func.func @transform_0(%arg0: i32, %arg1: i32) -> (i32, i32, i32) {
    %c0_i32 = arith.constant 0 : i32
    %c0_i32_0 = arith.constant 0 : i32
    return %arg1, %arg0, %c0_i32 : i32, i32, i32
  }
  func.func @transform_1(%arg0: i32, %arg1: i32) -> (i32, i32) {
    %c0_i32 = arith.constant 0 : i32
    %c0_i32_0 = arith.constant 0 : i32
    %c0_i32_1 = arith.constant 0 : i32
    return %c0_i32, %c0_i32_0 : i32, i32
  }
  func.func @transform_2(%arg0: i32, %arg1: i32) -> (i32, i32) {
    %c0_i32 = arith.constant 0 : i32
    %c0_i32_0 = arith.constant 0 : i32
    %c0_i32_1 = arith.constant 0 : i32
    return %c0_i32, %c0_i32_0 : i32, i32
  }
  func.func @transform_3(%arg0: i32, %arg1: i32) -> (i32, i32) {
    %c0_i32 = arith.constant 0 : i32
    %c0_i32_0 = arith.constant 0 : i32
    %c0_i32_1 = arith.constant 0 : i32
    return %c0_i32, %c0_i32_0 : i32, i32
  }
  func.func @transform_4(%arg0: i32, %arg1: i32) -> (i32, i32, i32) {
    %c0_i32 = arith.constant 0 : i32
    %c0_i32_0 = arith.constant 0 : i32
    return %arg1, %arg0, %c0_i32 : i32, i32, i32
  }
  func.func @transform_5(%arg0: i32, %arg1: i32) -> (i32, i32) {
    %c0_i32 = arith.constant 0 : i32
    %c0_i32_0 = arith.constant 0 : i32
    return %arg0, %c0_i32 : i32, i32
  }
}

</mosaic_0001>

<bundles_post_ra>
// kernel: tpu_custom_call.1
= control target key start
LH: loop header
LB: loop body
LE: loop exit
PB: predicated region body
PF: predicated region fallthrough
CT: control target
= control target key end

     0   :  { %11 = vsyncpa [#allocation6], 0  ;;  %s2497_s0 = inlined_call_operand.hbm [shape: bf16[8,8,32], index: 0, kind: input, shape index: {}]   ;;  %s2498_s1 = inlined_call_operand.hbm [shape: bf16[32,512], index: 1, kind: input, shape index: {}]   ;;  %s2499_s2 = inlined_call_operand.hbm [shape: bf16[128,512], index: 2, kind: input, shape index: {}]   ;;  %s2500_s3 = inlined_call_operand.vmem [shape: f32[1,512], index: 3, kind: input, shape index: {}]   ;;  %s2501_s4 = inlined_call_operand.hbm [shape: f32[8,8,128], index: 4, kind: output, shape index: {0}]   ;;  %s2502_s5 = inlined_call_operand.hbm [shape: f32[8,128], index: 5, kind: output, shape index: {1}]  }
   0x1   :  { %12 = vsyncpa [#allocation9], 0 }
   0x2   :  { %13 = vsyncpa [#allocation7], 0 }
   0x3   :  { %14 = vsyncpa [#allocation13], 0  ;;  %s1868_s18 = smov [#allocation8]   ;;  %s1750_s22 = scalar_lea.hbm %s2498_s1, 1024 }
   0x4   :  { %s32_s19 = sshll.u32 %s1868_s18, 4  ;;  %p1751_p0 = scmp.ne.s32.totalorder %s2498_s1, %s1750_s22  ;;  %s33_s19 = int_to_ptr.vmem [resolvable:$true] %s32_s19 }
   0x5   :  { %p1754_p1 = scmp.lt.u32.totalorder %s1750_s22, %s2498_s1 }
   0x7   :  { %p1756_p2 = pnand %p1754_p1, %p1751_p0 }
   0x9   :  { %1759 = shalt.err (!%p1756_p2)
}
   0xa   :  { %s1760_s27 = scalar_lea.vmem %s33_s19, 1024  ;;  %p1765_p4 = scmp.lt.s32.totalorder %s33_s19, %s33_s19 }
   0xb   :  { %p1761_p3 = scmp.ne.s32.totalorder %s33_s19, %s1760_s27  ;;  %p1766_p5 = scmp.lt.s32.totalorder %s1760_s27, %s1760_s27 }
   0xd   :  { %p1767_p6 = por %p1766_p5, %p1765_p4 }
   0xf   :  { %p1768_p7 = pnand %p1767_p6, %p1761_p3 }
  0x11   :  { %1771 = shalt.err (!%p1768_p7)
}
  0x12   :  { %s1869_s28 = smov 256   ;;  %s1870_s29 = smov 16  }
  0x13   :  { %38 = dma.hbm_to_vmem [thread:$0]  %s2498_s1, 1024, %s33_s19, [#allocation9], %s1869_s28, %s1869_s28, %s1870_s29  }
  0x14   :  { %s1871_s7 = smov [#allocation5]   ;;  %s1772_s11 = scalar_lea.hbm %s2497_s0, 512 }
  0x15   :  { %s20_s8 = sshll.u32 %s1871_s7, 4  ;;  %p1773_p8 = scmp.ne.s32.totalorder %s2497_s0, %s1772_s11  ;;  %s21_s8 = int_to_ptr.vmem [resolvable:$true] %s20_s8 }
  0x16   :  { %p1776_p9 = scmp.lt.u32.totalorder %s1772_s11, %s2497_s0 }
  0x18   :  { %p1778_p10 = pnand %p1776_p9, %p1773_p8 }
  0x1a   :  { %1781 = shalt.err (!%p1778_p10)
}
  0x1b   :  { %s1782_s16 = scalar_lea.vmem %s21_s8, 512  ;;  %p1787_p12 = scmp.lt.s32.totalorder %s21_s8, %s21_s8 }
  0x1c   :  { %p1783_p11 = scmp.ne.s32.totalorder %s21_s8, %s1782_s16  ;;  %p1788_p13 = scmp.lt.s32.totalorder %s1782_s16, %s1782_s16 }
  0x1e   :  { %p1789_p0 = por %p1788_p13, %p1787_p12 }
  0x20   :  { %p1790_p1 = pnand %p1789_p0, %p1783_p11 }
  0x22   :  { %1793 = shalt.err (!%p1790_p1)
}
  0x23   :  { %s1872_s1 = smov 64   ;;  %s1873_s17 = smov 4  }
  0x24   :  { %26 = dma.hbm_to_vmem [thread:$0]  %s2497_s0, 512, %s21_s8, [#allocation6], %s1872_s1, %s1872_s1, %s1873_s17  }
  0x25   :  { %s1874_s20 = smov [#allocation10]   ;;  %s1794_s24 = scalar_lea.hbm %s2499_s2, 4096 }
  0x26   :  { %s44_s21 = sshll.u32 %s1874_s20, 4  ;;  %p1795_p2 = scmp.ne.s32.totalorder %s2499_s2, %s1794_s24  ;;  %s45_s21 = int_to_ptr.vmem [resolvable:$true] %s44_s21 }
  0x27   :  { %p1798_p3 = scmp.lt.u32.totalorder %s1794_s24, %s2499_s2 }
  0x29   :  { %p1800_p4 = pnand %p1798_p3, %p1795_p2 }
  0x2b   :  { %1803 = shalt.err (!%p1800_p4)
}
  0x2c   :  { %s1804_s6 = scalar_lea.vmem %s45_s21, 4096  ;;  %p1809_p6 = scmp.lt.s32.totalorder %s45_s21, %s45_s21 }
  0x2d   :  { %p1805_p5 = scmp.ne.s32.totalorder %s45_s21, %s1804_s6  ;;  %p1810_p7 = scmp.lt.s32.totalorder %s1804_s6, %s1804_s6 }
  0x2f   :  { %p1811_p8 = por %p1810_p7, %p1809_p6 }
  0x31   :  { %p1812_p9 = pnand %p1811_p8, %p1805_p5 }
  0x33   :  { %1815 = shalt.err (!%p1812_p9)
}
  0x34   :  { %50 = dma.hbm_to_vmem [thread:$0]  %s2499_s2, 4096, %s45_s21, [#allocation9], %s1869_s28, %s1869_s28, %s1870_s29  }
  0x35   :  { %1860 = dma.done.wait [#allocation6], 512  }
  0x36   :  { %1861 = vsyncadd [#allocation6], 4294966784 }
  0x37   :  { %1862 = dma.done.wait [#allocation9], 5120  }
  0x38   :  { %1863 = vsyncadd [#allocation9], 4294962176  ;;  %v2503_v0 = vmov 0   ;;  %v1574_v1 = vld [vmem:[#allocation8 + $0x4] ss:$16 sps:$4 sm:$0xff]   ;;  %vm167_vm0 = vcmask 261120   ;;  %v87_v46 = vlaneseq }
  0x39   :  { %212 = vmatprep.mubr.bf16.mxu0 %v2503_v0  ;;  %285 = vmatprep.mubr.bf16.mxu1 %v2503_v0  ;;  %v1576_v2 = vld [vmem:[#allocation8 + $0xc] ss:$16 sps:$4 sm:$0xff]   ;;  %v1578_v3 = vld [vmem:[#allocation8] ss:$16 sps:$4 sm:$0xff]   ;;  %v1579_v4 = vld [vmem:[#allocation8 + $0x8] ss:$16 sps:$4 sm:$0xff]  }
  0x3a   :  { %180 = vmatprep.subr.bf16.mxu0 %v1574_v1  ;;  %253 = vmatprep.subr.bf16.mxu1 %v1576_v2  ;;  %v1580_v5 = vld [vmem:[#allocation8 + $0x24] ss:$16 sps:$4 sm:$0xff]   ;;  %v1582_v6 = vld [vmem:[#allocation8 + $0x2c] ss:$16 sps:$4 sm:$0xff]   ;;  %v1584_v7 = vld [vmem:[#allocation8 + $0x20] ss:$16 sps:$4 sm:$0xff]  }
  0x3b   :  { %181 = vmatpush1.bf16.msra.mxu0 %v1578_v3  ;;  %254 = vmatpush1.bf16.msra.mxu1 %v1579_v4  ;;  %v1585_v8 = vld [vmem:[#allocation8 + $0x28] ss:$16 sps:$4 sm:$0xff]   ;;  %v1586_v9 = vld [vmem:[#allocation5] sm:$0xff]   ;;  %v1957_v11 = vld [vmem:[#allocation10 + $0xc] ss:$16 sps:$4 sm:$0xff]   ;;  %v1876_v45 = vmov 0.0|0.0  }
  0x3c   :  { %182 = vmatprep.subr.bf16.mxu0 %v1580_v5  ;;  %255 = vmatprep.subr.bf16.mxu1 %v1582_v6  ;;  %v1955_v10 = vld [vmem:[#allocation10 + $0x4] ss:$16 sps:$4 sm:$0xff]   ;;  %v1959_v12 = vld [vmem:[#allocation10] ss:$16 sps:$4 sm:$0xff]   ;;  %v1961_v13 = vld [vmem:[#allocation10 + $0x8] ss:$16 sps:$4 sm:$0xff]  }
  0x3d   :  { %v1964_v14 = vld [vmem:[#allocation10 + $0x24] ss:$16 sps:$4 sm:$0xff]   ;;  %v1967_v15 = vld [vmem:[#allocation10 + $0x2c] ss:$16 sps:$4 sm:$0xff]   ;;  %v1971_v16 = vld [vmem:[#allocation10 + $0x20] ss:$16 sps:$4 sm:$0xff]  }
  0x3e   :  { %v1975_v17 = vld [vmem:[#allocation10 + $0x28] ss:$16 sps:$4 sm:$0xff]   ;;  %v1979_v18 = vld [vmem:[#allocation10 + $0x44] ss:$16 sps:$4 sm:$0xff]   ;;  %v1983_v20 = vld [vmem:[#allocation10 + $0x4c] ss:$16 sps:$4 sm:$0xff]  }
  0x3f   :  { %183 = vmatpush1.bf16.msra.mxu0 %v1584_v7  ;;  %256 = vmatpush1.bf16.msra.mxu1 %v1585_v8  ;;  %v1599_v19 = vld [vmem:[#allocation5 + $0x8] sm:$0xff]   ;;  %v1985_v21 = vld [vmem:[#allocation10 + $0x40] ss:$16 sps:$4 sm:$0xff]   ;;  %v1993_v23 = vld [vmem:[#allocation10 + $0x64] ss:$16 sps:$4 sm:$0xff]   ;;  %v88_v47 = vshrl.u32 %v87_v46, 7 }
  0x40   :  { %560 = vmatprep.subr.bf16.mxu0 %v1955_v10  ;;  %601 = vmatprep.subr.bf16.mxu1 %v1957_v11  ;;  %v1989_v22 = vld [vmem:[#allocation10 + $0x48] ss:$16 sps:$4 sm:$0xff]   ;;  %v1995_v24 = vld [vmem:[#allocation10 + $0x6c] ss:$16 sps:$4 sm:$0xff]   ;;  %v1999_v25 = vld [vmem:[#allocation10 + $0x60] ss:$16 sps:$4 sm:$0xff]  }
  0x41   :  { %v2003_v26 = vld [vmem:[#allocation10 + $0x68] ss:$16 sps:$4 sm:$0xff]   ;;  %v2007_v27 = vld [vmem:[#allocation10 + $0x84] ss:$16 sps:$4 sm:$0xff]   ;;  %v2009_v28 = vld [vmem:[#allocation10 + $0x8c] ss:$16 sps:$4 sm:$0xff]  }
  0x42   :  { %1521 = vmatmul.mubr.msk.bf16.vlgmr.msra.gmra.mrb[0].mxu0 %vm167_vm0, %v1586_v9  ;;  %1525 = vmatmul.mubr.msk.bf16.vlgmr.msra.gmra.mrb[0].mxu1 %vm167_vm0, %v1586_v9  ;;  %v1612_v29 = vld [vmem:[#allocation5 + $0x10] sm:$0xff]   ;;  %v2015_v31 = vld [vmem:[#allocation10 + $0x88] ss:$16 sps:$4 sm:$0xff]   ;;  %v2023_v33 = vld [vmem:[#allocation10 + $0xac] ss:$16 sps:$4 sm:$0xff]   ;;  %v97_v48 = vsub.s32 2, %v88_v47 }
  0x43   :  { %561 = vmatpush1.bf16.msra.mxu0 %v1959_v12  ;;  %602 = vmatpush1.bf16.msra.mxu1 %v1961_v13  ;;  %v2013_v30 = vld [vmem:[#allocation10 + $0x80] ss:$16 sps:$4 sm:$0xff]   ;;  %v2019_v32 = vld [vmem:[#allocation10 + $0xa4] ss:$16 sps:$4 sm:$0xff]   ;;  %v2029_v35 = vld [vmem:[#allocation10 + $0xa8] ss:$16 sps:$4 sm:$0xff]  }
  0x44   :  { %562 = vmatprep.subr.bf16.mxu0 %v1964_v14  ;;  %603 = vmatprep.subr.bf16.mxu1 %v1967_v15  ;;  %v2027_v34 = vld [vmem:[#allocation10 + $0xa0] ss:$16 sps:$4 sm:$0xff]   ;;  %v2033_v36 = vld [vmem:[#allocation10 + $0xc4] ss:$16 sps:$4 sm:$0xff]   ;;  %v2037_v37 = vld [vmem:[#allocation10 + $0xcc] ss:$16 sps:$4 sm:$0xff]  }
  0x45   :  { %222 = vmatprep.mubr.bf16.mxu0 %v2503_v0  ;;  %295 = vmatprep.mubr.bf16.mxu1 %v2503_v0  ;;  %v1625_v38 = vld [vmem:[#allocation5 + $0x18] sm:$0xff]   ;;  %v2043_v39 = vld [vmem:[#allocation10 + $0xc0] ss:$16 sps:$4 sm:$0xff]   ;;  %v2049_v41 = vld [vmem:[#allocation10 + $0xe4] ss:$16 sps:$4 sm:$0xff]   ;;  %v101_v49 = vsub.s32 3, %v88_v47 }
  0x46   :  { %v2045_v40 = vld [vmem:[#allocation10 + $0xc8] ss:$16 sps:$4 sm:$0xff]   ;;  %v2051_v42 = vld [vmem:[#allocation10 + $0xec] ss:$16 sps:$4 sm:$0xff]   ;;  %v2057_v43 = vld [vmem:[#allocation10 + $0xe0] ss:$16 sps:$4 sm:$0xff]  }
  0x47   :  { %563 = vmatpush1.bf16.msra.mxu0 %v1971_v16  ;;  %604 = vmatpush1.bf16.msra.mxu1 %v1975_v17  ;;  %v2059_v44 = vld [vmem:[#allocation10 + $0xe8] ss:$16 sps:$4 sm:$0xff]   ;;  %v89_v50 = vsub.s32 0, %v88_v47  ;;  %v85_v51 = vld [vmem:[%s2500_s3] sm:$0xf]  ;;  %v93_v52 = vsub.s32 1, %v88_v47 }
  0x48   :  { %564 = vmatprep.subr.bf16.mxu0 %v1979_v18  ;;  %605 = vmatprep.subr.bf16.mxu1 %v1983_v20  ;;  %v2106_v53 = vrot.slane %v85_v51, %v97_v48  ;;  %v2112_v56 = vrot.slane %v85_v51, %v101_v49  ;;  %s1877_s3 = smov [#allocation12]  }
  0x49   :  { %v90_v57 = vrot.slane %v85_v51, %v89_v50  ;;  %v94_v60 = vrot.slane %v85_v51, %v93_v52  ;;  %s1488_s29 = sshll.u32 %s1877_s3, 4  ;;  %s1489_s29 = int_to_ptr.vmem [resolvable:$true] %s1488_s29 }
  0x4a   :  { %1522 = vmatmul.mubr.msk.bf16.gmra.mrb[4].mxu0 %vm167_vm0, %v1599_v19  ;;  %1526 = vmatmul.mubr.msk.bf16.gmra.mrb[4].mxu1 %vm167_vm0, %v1599_v19  ;;  %s1816_s8 = scalar_lea.vmem %s1489_s29, 128  ;;  %p1821_p11 = scmp.lt.s32.totalorder %s1489_s29, %s1489_s29 }
  0x4b   :  { %565 = vmatpush1.bf16.msra.mxu0 %v1985_v21  ;;  %606 = vmatpush1.bf16.msra.mxu1 %v1989_v22  ;;  %p1817_p10 = scmp.ne.s32.totalorder %s1489_s29, %s1816_s8  ;;  %p1822_p12 = scmp.lt.s32.totalorder %s1816_s8, %s1816_s8 }
  0x4c   :  { %566 = vmatprep.subr.bf16.mxu0 %v1993_v23  ;;  %607 = vmatprep.subr.bf16.mxu1 %v1995_v24 }
  0x4d   :  { %232 = vmatprep.mubr.bf16.mxu0 %v2503_v0  ;;  %305 = vmatprep.mubr.bf16.mxu1 %v2503_v0  ;;  %p1823_p13 = por %p1822_p12, %p1821_p11 }
  0x4f   :  { %567 = vmatpush1.bf16.msra.mxu0 %v1999_v25  ;;  %608 = vmatpush1.bf16.msra.mxu1 %v2003_v26  ;;  %p1824_p0 = pnand %p1823_p13, %p1817_p10 }
  0x50   :  { %568 = vmatprep.subr.bf16.mxu0 %v2007_v27  ;;  %609 = vmatprep.subr.bf16.mxu1 %v2009_v28 }
  0x52   :  { %1523 = vmatmul.mubr.msk.bf16.gmra.mrb[8].mxu0 %vm167_vm0, %v1612_v29  ;;  %1527 = vmatmul.mubr.msk.bf16.gmra.mrb[8].mxu1 %vm167_vm0, %v1612_v29 }
  0x53   :  { %569 = vmatpush1.bf16.msra.mxu0 %v2013_v30  ;;  %610 = vmatpush1.bf16.msra.mxu1 %v2015_v31 }
  0x54   :  { %570 = vmatprep.subr.bf16.mxu0 %v2019_v32  ;;  %611 = vmatprep.subr.bf16.mxu1 %v2023_v33 }
  0x55   :  { %242 = vmatprep.mubr.bf16.mxu0 %v2503_v0  ;;  %315 = vmatprep.mubr.bf16.mxu1 %v2503_v0 }
  0x57   :  { %571 = vmatpush1.bf16.msra.mxu0 %v2027_v34  ;;  %612 = vmatpush1.bf16.msra.mxu1 %v2029_v35 }
  0x58   :  { %572 = vmatprep.subr.bf16.mxu0 %v2033_v36  ;;  %613 = vmatprep.subr.bf16.mxu1 %v2037_v37 }
  0x5a   :  { %1524 = vmatmul.mubr.msk.bf16.gmra.mrb[12].mxu0 %vm167_vm0, %v1625_v38  ;;  %1528 = vmatmul.mubr.msk.bf16.gmra.mrb[12].mxu1 %vm167_vm0, %v1625_v38 }
  0x5b   :  { %573 = vmatpush1.bf16.msra.mxu0 %v2043_v39  ;;  %614 = vmatpush1.bf16.msra.mxu1 %v2045_v40 }
  0x5c   :  { %574 = vmatprep.subr.bf16.mxu0 %v2049_v41  ;;  %615 = vmatprep.subr.bf16.mxu1 %v2051_v42 }
  0x5d   :  { %592 = vmatprep.mubr.bf16.mxu0 %v2503_v0  ;;  %633 = vmatprep.mubr.bf16.mxu1 %v2503_v0 }
  0x5f   :  { %575 = vmatpush1.bf16.msra.mxu0 %v2057_v43  ;;  %616 = vmatpush1.bf16.msra.mxu1 %v2059_v44 }
  0x60   :  { %673 = vmatprep.subr.bf16.mxu0 %v1955_v10  ;;  %714 = vmatprep.subr.bf16.mxu1 %v1957_v11 }
  0x62   :  { %593 = vmatmul.mubr.bf16.vlgmr.msra.gmra.mrb[16].mxu0 %v1876_v45  ;;  %634 = vmatmul.mubr.bf16.vlgmr.msra.gmra.mrb[16].mxu1 %v1876_v45 }
  0x63   :  { %674 = vmatpush1.bf16.msra.mxu0 %v1959_v12  ;;  %715 = vmatpush1.bf16.msra.mxu1 %v1961_v13 }
  0x64   :  { %675 = vmatprep.subr.bf16.mxu0 %v1964_v14  ;;  %716 = vmatprep.subr.bf16.mxu1 %v1967_v15 }
  0x65   :  { %705 = vmatprep.mubr.bf16.mxu0 %v2503_v0  ;;  %746 = vmatprep.mubr.bf16.mxu1 %v2503_v0 }
  0x67   :  { %676 = vmatpush1.bf16.msra.mxu0 %v1971_v16  ;;  %717 = vmatpush1.bf16.msra.mxu1 %v1975_v17 }
  0x68   :  { %677 = vmatprep.subr.bf16.mxu0 %v1979_v18  ;;  %718 = vmatprep.subr.bf16.mxu1 %v1983_v20 }
  0x6b   :  { %678 = vmatpush1.bf16.msra.mxu0 %v1985_v21  ;;  %719 = vmatpush1.bf16.msra.mxu1 %v1989_v22 }
  0x6c   :  { %679 = vmatprep.subr.bf16.mxu0 %v1993_v23  ;;  %720 = vmatprep.subr.bf16.mxu1 %v1995_v24 }
  0x6f   :  { %680 = vmatpush1.bf16.msra.mxu0 %v1999_v25  ;;  %721 = vmatpush1.bf16.msra.mxu1 %v2003_v26 }
  0x70   :  { %681 = vmatprep.subr.bf16.mxu0 %v2007_v27  ;;  %722 = vmatprep.subr.bf16.mxu1 %v2009_v28 }
  0x73   :  { %682 = vmatpush1.bf16.msra.mxu0 %v2013_v30  ;;  %723 = vmatpush1.bf16.msra.mxu1 %v2015_v31 }
  0x74   :  { %683 = vmatprep.subr.bf16.mxu0 %v2019_v32  ;;  %724 = vmatprep.subr.bf16.mxu1 %v2023_v33 }
  0x77   :  { %684 = vmatpush1.bf16.msra.mxu0 %v2027_v34  ;;  %725 = vmatpush1.bf16.msra.mxu1 %v2029_v35 }
  0x78   :  { %685 = vmatprep.subr.bf16.mxu0 %v2033_v36  ;;  %726 = vmatprep.subr.bf16.mxu1 %v2037_v37 }
  0x7b   :  { %686 = vmatpush1.bf16.msra.mxu0 %v2043_v39  ;;  %727 = vmatpush1.bf16.msra.mxu1 %v2045_v40 }
  0x7c   :  { %687 = vmatprep.subr.bf16.mxu0 %v2049_v41  ;;  %728 = vmatprep.subr.bf16.mxu1 %v2051_v42 }
  0x7f   :  { %688 = vmatpush1.bf16.msra.mxu0 %v2057_v43  ;;  %729 = vmatpush1.bf16.msra.mxu1 %v2059_v44 }
  0x80   :  { %787 = vmatprep.subr.bf16.mxu0 %v1955_v10  ;;  %828 = vmatprep.subr.bf16.mxu1 %v1957_v11 }
 0x115   :  { %v2108_v54 = vpop.f32.mrb[0].mxu0  ;;  %v2110_v55 = vpop.f32.mrb[0].mxu1 }
 0x116   :  { %v216_v58 = vpop.f32.mrb[1].mxu0  ;;  %v289_v59 = vpop.f32.mrb[1].mxu1 }
 0x117   :  { %v218_v61 = vpop.f32.mrb[2].mxu0  ;;  %v291_v62 = vpop.f32.mrb[2].mxu1 }
 0x118   :  { %v2114_v63 = vadd.f32 %v218_v61, %v90_v57  ;;  %v220_v1 = vpop.f32.mrb[3].mxu0  ;;  %v2117_v2 = vadd.f32 %v291_v62, %v2106_v53  ;;  %v293_v3 = vpop.f32.mrb[3].mxu1 }
 0x119   :  { %v2119_v4 = vadd.f32 %v220_v1, %v94_v60  ;;  %v2122_v5 = vadd.f32 %v293_v3, %v2112_v56 }
 0x11d   :  { %v224_v6 = vpop.f32.mrb[4].mxu0  ;;  %v297_v7 = vpop.f32.mrb[4].mxu1 }
 0x11e   :  { %v2124_v8 = vadd.f32 %v224_v6, %v90_v57  ;;  %v226_v9 = vpop.f32.mrb[5].mxu0  ;;  %v2127_v19 = vadd.f32 %v297_v7, %v2106_v53  ;;  %v299_v29 = vpop.f32.mrb[5].mxu1 }
 0x11f   :  { %v2129_v38 = vadd.f32 %v226_v9, %v94_v60  ;;  %v228_v45 = vpop.f32.mrb[6].mxu0  ;;  %v2132_v46 = vadd.f32 %v299_v29, %v2112_v56  ;;  %v301_v47 = vpop.f32.mrb[6].mxu1 }
 0x120   :  { %v2134_v48 = vadd.f32 %v228_v45, %v90_v57  ;;  %v230_v49 = vpop.f32.mrb[7].mxu0  ;;  %v2137_v50 = vadd.f32 %v301_v47, %v2106_v53  ;;  %v303_v51 = vpop.f32.mrb[7].mxu1 }
 0x121   :  { %2505 = vst [vmem:[#allocation18_spill] sm:$0xff] %v2132_v46  ;;  %v2139_v52 = vadd.f32 %v230_v49, %v94_v60  ;;  %v2142_v61 = vadd.f32 %v303_v51, %v2112_v56 }
 0x122   :  { %2506 = vst [vmem:[#allocation19_spill] sm:$0xff] %v2134_v48  ;;  %2507 = vst [vmem:[#allocation20_spill] sm:$0xff] %v2137_v50 }
 0x123   :  { %2508 = vst [vmem:[#allocation21_spill] sm:$0xff] %v2139_v52  ;;  %2509 = vst [vmem:[#allocation22_spill] sm:$0xff] %v2142_v61 }
 0x125   :  { %v234_v62 = vpop.f32.mrb[8].mxu0  ;;  %v307_v1 = vpop.f32.mrb[8].mxu1 }
 0x126   :  { %v2144_v3 = vadd.f32 %v234_v62, %v90_v57  ;;  %v236_v6 = vpop.f32.mrb[9].mxu0  ;;  %v2147_v7 = vadd.f32 %v307_v1, %v2106_v53  ;;  %v309_v9 = vpop.f32.mrb[9].mxu1 }
 0x127   :  { %v2149_v29 = vadd.f32 %v236_v6, %v94_v60  ;;  %v238_v45 = vpop.f32.mrb[10].mxu0  ;;  %v2152_v47 = vadd.f32 %v309_v9, %v2112_v56  ;;  %v311_v49 = vpop.f32.mrb[10].mxu1 }
 0x128   :  { %2510 = vst [vmem:[#allocation23_spill] sm:$0xff] %v2144_v3  ;;  %2511 = vst [vmem:[#allocation24_spill] sm:$0xff] %v2147_v7  ;;  %v2154_v0 = vadd.f32 %v238_v45, %v90_v57  ;;  %v240_v51 = vpop.f32.mrb[11].mxu0  ;;  %v2157_v61 = vadd.f32 %v311_v49, %v2106_v53  ;;  %v313_v62 = vpop.f32.mrb[11].mxu1 }
 0x129   :  { %2512 = vst [vmem:[#allocation25_spill] sm:$0xff] %v2149_v29  ;;  %2513 = vst [vmem:[#allocation26_spill] sm:$0xff] %v2152_v47  ;;  %v2159_v3 = vadd.f32 %v240_v51, %v94_v60  ;;  %v2162_v1 = vadd.f32 %v313_v62, %v2112_v56 }
 0x12a   :  { %2514 = vst [vmem:[#allocation27_spill] sm:$0xff] %v2154_v0  ;;  %2515 = vst [vmem:[#allocation28_spill] sm:$0xff] %v2157_v61 }
 0x12b   :  { %2516 = vst [vmem:[#allocation29_spill] sm:$0xff] %v2159_v3  ;;  %2517 = vst [vmem:[#allocation30_spill] sm:$0xff] %v2162_v1 }
 0x12d   :  { %v244_v7 = vpop.f32.mrb[12].mxu0  ;;  %v317_v6 = vpop.f32.mrb[12].mxu1 }
 0x12e   :  { %v2164_v29 = vadd.f32 %v244_v7, %v90_v57  ;;  %v246_v52 = vpop.f32.mrb[13].mxu0  ;;  %v2167_v9 = vadd.f32 %v317_v6, %v2106_v53  ;;  %v319_v45 = vpop.f32.mrb[13].mxu1 }
 0x12f   :  { %v2169_v0 = vadd.f32 %v246_v52, %v94_v60  ;;  %v248_v47 = vpop.f32.mrb[14].mxu0  ;;  %v2172_v49 = vadd.f32 %v319_v45, %v2112_v56  ;;  %v321_v51 = vpop.f32.mrb[14].mxu1  ;;  %v215_v52 = vadd.f32 %v2108_v54, %v90_v57  ;;  %v217_v45 = vadd.f32 %v216_v58, %v94_v60 }
 0x130   :  { %2518 = vst [vmem:[#allocation31_spill] sm:$0xff] %v2164_v29  ;;  %2519 = vst [vmem:[#allocation32_spill] sm:$0xff] %v2167_v9  ;;  %v2174_v3 = vadd.f32 %v248_v47, %v90_v57  ;;  %v250_v62 = vpop.f32.mrb[15].mxu0  ;;  %v2177_v1 = vadd.f32 %v321_v51, %v2106_v53  ;;  %v323_v7 = vpop.f32.mrb[15].mxu1 }
 0x131   :  { %2520 = vst [vmem:[#allocation33_spill] sm:$0xff] %v2169_v0  ;;  %2521 = vst [vmem:[#allocation34_spill] sm:$0xff] %v2172_v49  ;;  %v2179_v29 = vadd.f32 %v250_v62, %v94_v60  ;;  %v2182_v6 = vadd.f32 %v323_v7, %v2112_v56  ;;  %v288_v0 = vadd.f32 %v2110_v55, %v2106_v53 }
 0x132   :  { %2522 = vst [vmem:[#allocation35_spill] sm:$0xff] %v2174_v3  ;;  %2523 = vst [vmem:[#allocation36_spill] sm:$0xff] %v2177_v1  ;;  %v290_v49 = vadd.f32 %v289_v59, %v2112_v56 }
 0x133   :  { %2524 = vst [vmem:[#allocation37_spill] sm:$0xff] %v2179_v29  ;;  %2525 = vst [vmem:[#allocation38_spill] sm:$0xff] %v2182_v6 }
 0x135   :  { %v594_v47 = vpop.f32.mrb[16].mxu0  ;;  %v635_v3 = vpop.f32.mrb[16].mxu1 }
 0x136   :  { %v642_v9 = vadd.f32 %v594_v47, %v215_v52  ;;  %v644_v61 = vadd.f32 %v635_v3, %v288_v0  ;;  %v596_v51 = vpop.f32.mrb[17].mxu0  ;;  %v637_v1 = vpop.f32.mrb[17].mxu1 }
 0x137   :  { %v643_v50 = vadd.f32 %v596_v51, %v217_v45  ;;  %v645_v62 = vadd.f32 %v637_v1, %v290_v49  ;;  %v598_v29 = vpop.f32.mrb[18].mxu0  ;;  %v639_v48 = vpop.f32.mrb[18].mxu1 }
 0x138   :  { %v646_v7 = vmul.f32 0.5, %v642_v9  ;;  %v599_v6 = vpop.f32.mrb[19].mxu0  ;;  %v640_v46 = vpop.f32.mrb[19].mxu1 }
 0x139   :  { %v650_v54 = vmul.f32 0.5, %v643_v50  ;;  %v655_v53 = vmul.f32 0.5, %v645_v62  ;;  %v2526_v6 = vmov 0  }
 0x13a   :  { %1638 = vtanh.f32 %v646_v7 }
 0x13b   :  { %1640 = vtanh.f32 %v650_v54 }
 0x13c   :  { %1642 = vtanh.f32 %v644_v61 }
 0x13d   :  { %1644 = vtanh.f32 %v655_v53 }
 0x144   :  { %v1639_v55 = vpop.eup %1638 }
 0x145   :  { %v1641_v56 = vpop.eup %1640  ;;  %v648_v57 = vmul.f32 0.5, %v1639_v55 }
 0x146   :  { %v652_v58 = vmul.f32 0.5, %v1641_v56  ;;  %v1643_v59 = vpop.eup %1642 }
 0x147   :  { %v649_v0 = vadd.f32 0.5, %v648_v57  ;;  %v1645_v46 = vpop.eup %1644 }
 0x148   :  { %v653_v60 = vadd.f32 0.5, %v652_v58  ;;  %v657_v48 = vmul.f32 0.5, %v1645_v46 }
 0x149   :  { %v660_v3 = vmul.f32 %v1643_v59, %v649_v0 }
 0x14a   :  { %v659_v1 = vmul.f32 0.0, %v653_v60  ;;  %v658_v50 = vadd.f32 0.5, %v657_v48 }
 0x14c   :  { %v2188_v29 = vadd.f32 %v660_v3, %v659_v1 }
 0x14e   :  { %1646 = vtanh.f32 %v2188_v29 }
 0x158   :  { %v1647_v9 = vpop.eup %1646 }
 0x159   :  { %v663_v61 = vmul.f32 %v1647_v9, %v658_v50 }
 0x15b   :  { %664 = vst [vmem:[#allocation11] sm:$0xff] %v663_v61  ;;  %v672_v49 = vpack.c.bf16 %v663_v61, %v663_v61 }
 0x15d   :  { %706 = vmatmul.mubr.bf16.vlgmr.msra.gmra.mrb[20].mxu0 %v672_v49  ;;  %747 = vmatmul.mubr.bf16.vlgmr.msra.gmra.mrb[20].mxu1 %v672_v49 }
 0x15e   :  { %788 = vmatpush1.bf16.msra.mxu0 %v1959_v12  ;;  %829 = vmatpush1.bf16.msra.mxu1 %v1961_v13 }
 0x15f   :  { %789 = vmatprep.subr.bf16.mxu0 %v1964_v14  ;;  %830 = vmatprep.subr.bf16.mxu1 %v1967_v15 }
 0x160   :  { %819 = vmatprep.mubr.bf16.mxu0 %v2526_v6  ;;  %860 = vmatprep.mubr.bf16.mxu1 %v2526_v6 }
 0x162   :  { %790 = vmatpush1.bf16.msra.mxu0 %v1971_v16  ;;  %831 = vmatpush1.bf16.msra.mxu1 %v1975_v17 }
 0x163   :  { %791 = vmatprep.subr.bf16.mxu0 %v1979_v18  ;;  %832 = vmatprep.subr.bf16.mxu1 %v1983_v20 }
 0x166   :  { %792 = vmatpush1.bf16.msra.mxu0 %v1985_v21  ;;  %833 = vmatpush1.bf16.msra.mxu1 %v1989_v22 }
 0x167   :  { %793 = vmatprep.subr.bf16.mxu0 %v1993_v23  ;;  %834 = vmatprep.subr.bf16.mxu1 %v1995_v24 }
 0x16a   :  { %794 = vmatpush1.bf16.msra.mxu0 %v1999_v25  ;;  %835 = vmatpush1.bf16.msra.mxu1 %v2003_v26 }
 0x16b   :  { %795 = vmatprep.subr.bf16.mxu0 %v2007_v27  ;;  %836 = vmatprep.subr.bf16.mxu1 %v2009_v28 }
 0x16e   :  { %796 = vmatpush1.bf16.msra.mxu0 %v2013_v30  ;;  %837 = vmatpush1.bf16.msra.mxu1 %v2015_v31 }
 0x16f   :  { %797 = vmatprep.subr.bf16.mxu0 %v2019_v32  ;;  %838 = vmatprep.subr.bf16.mxu1 %v2023_v33 }
 0x172   :  { %798 = vmatpush1.bf16.msra.mxu0 %v2027_v34  ;;  %839 = vmatpush1.bf16.msra.mxu1 %v2029_v35 }
 0x173   :  { %799 = vmatprep.subr.bf16.mxu0 %v2033_v36  ;;  %840 = vmatprep.subr.bf16.mxu1 %v2037_v37 }
 0x176   :  { %800 = vmatpush1.bf16.msra.mxu0 %v2043_v39  ;;  %841 = vmatpush1.bf16.msra.mxu1 %v2045_v40 }
 0x177   :  { %801 = vmatprep.subr.bf16.mxu0 %v2049_v41  ;;  %842 = vmatprep.subr.bf16.mxu1 %v2051_v42 }
 0x17a   :  { %802 = vmatpush1.bf16.msra.mxu0 %v2057_v43  ;;  %843 = vmatpush1.bf16.msra.mxu1 %v2059_v44 }
 0x17b   :  { %901 = vmatprep.subr.bf16.mxu0 %v1955_v10  ;;  %942 = vmatprep.subr.bf16.mxu1 %v1957_v11 }
 0x230   :  { %v707_v52 = vpop.f32.mrb[20].mxu0  ;;  %v748_v45 = vpop.f32.mrb[20].mxu1 }
 0x231   :  { %v755_v47 = vadd.f32 %v707_v52, %v2114_v63  ;;  %v757_v51 = vadd.f32 %v748_v45, %v2117_v2  ;;  %v709_v62 = vpop.f32.mrb[21].mxu0  ;;  %v750_v7 = vpop.f32.mrb[21].mxu1 }
 0x232   :  { %v756_v54 = vadd.f32 %v709_v62, %v2119_v4  ;;  %v758_v53 = vadd.f32 %v750_v7, %v2122_v5  ;;  %v711_v55 = vpop.f32.mrb[22].mxu0  ;;  %v752_v56 = vpop.f32.mrb[22].mxu1 }
 0x233   :  { %v759_v57 = vmul.f32 0.5, %v755_v47  ;;  %v712_v58 = vpop.f32.mrb[23].mxu0  ;;  %v753_v0 = vpop.f32.mrb[23].mxu1 }
 0x234   :  { %v763_v59 = vmul.f32 0.5, %v756_v54  ;;  %v768_v60 = vmul.f32 0.5, %v758_v53 }
 0x235   :  { %1648 = vtanh.f32 %v759_v57  ;;  %v2527_v57 = vld [vmem:[#allocation18_spill] sm:$0xff] }
 0x236   :  { %1650 = vtanh.f32 %v763_v59 }
 0x237   :  { %1652 = vtanh.f32 %v757_v51 }
 0x238   :  { %1654 = vtanh.f32 %v768_v60 }
 0x23f   :  { %v1649_v3 = vpop.eup %1648 }
 0x240   :  { %v1651_v63 = vpop.eup %1650  ;;  %v761_v1 = vmul.f32 0.5, %v1649_v3 }
 0x241   :  { %v765_v2 = vmul.f32 0.5, %v1651_v63  ;;  %v1653_v48 = vpop.eup %1652 }
 0x242   :  { %v762_v46 = vadd.f32 0.5, %v761_v1  ;;  %v1655_v61 = vpop.eup %1654 }
 0x243   :  { %v766_v4 = vadd.f32 0.5, %v765_v2  ;;  %v770_v49 = vmul.f32 0.5, %v1655_v61 }
 0x244   :  { %v773_v50 = vmul.f32 %v1653_v48, %v762_v46 }
 0x245   :  { %v772_v5 = vmul.f32 %v766_v4, %v2188_v29  ;;  %v771_v52 = vadd.f32 0.5, %v770_v49 }
 0x247   :  { %v2230_v9 = vadd.f32 %v773_v50, %v772_v5 }
 0x249   :  { %1656 = vtanh.f32 %v2230_v9 }
 0x253   :  { %v1657_v45 = vpop.eup %1656 }
 0x254   :  { %v776_v47 = vmul.f32 %v1657_v45, %v771_v52 }
 0x256   :  { %778 = vst [vmem:[#allocation11 + $0x8] sm:$0xff] %v776_v47  ;;  %v786_v51 = vpack.c.bf16 %v776_v47, %v776_v47 }
 0x258   :  { %820 = vmatmul.mubr.bf16.vlgmr.msra.gmra.mrb[24].mxu0 %v786_v51  ;;  %861 = vmatmul.mubr.bf16.vlgmr.msra.gmra.mrb[24].mxu1 %v786_v51 }
 0x259   :  { %902 = vmatpush1.bf16.msra.mxu0 %v1959_v12  ;;  %943 = vmatpush1.bf16.msra.mxu1 %v1961_v13 }
 0x25a   :  { %903 = vmatprep.subr.bf16.mxu0 %v1964_v14  ;;  %944 = vmatprep.subr.bf16.mxu1 %v1967_v15 }
 0x25b   :  { %933 = vmatprep.mubr.bf16.mxu0 %v2526_v6  ;;  %974 = vmatprep.mubr.bf16.mxu1 %v2526_v6 }
 0x25d   :  { %904 = vmatpush1.bf16.msra.mxu0 %v1971_v16  ;;  %945 = vmatpush1.bf16.msra.mxu1 %v1975_v17 }
 0x25e   :  { %905 = vmatprep.subr.bf16.mxu0 %v1979_v18  ;;  %946 = vmatprep.subr.bf16.mxu1 %v1983_v20 }
 0x261   :  { %906 = vmatpush1.bf16.msra.mxu0 %v1985_v21  ;;  %947 = vmatpush1.bf16.msra.mxu1 %v1989_v22 }
 0x262   :  { %907 = vmatprep.subr.bf16.mxu0 %v1993_v23  ;;  %948 = vmatprep.subr.bf16.mxu1 %v1995_v24 }
 0x265   :  { %908 = vmatpush1.bf16.msra.mxu0 %v1999_v25  ;;  %949 = vmatpush1.bf16.msra.mxu1 %v2003_v26 }
 0x266   :  { %909 = vmatprep.subr.bf16.mxu0 %v2007_v27  ;;  %950 = vmatprep.subr.bf16.mxu1 %v2009_v28 }
 0x269   :  { %910 = vmatpush1.bf16.msra.mxu0 %v2013_v30  ;;  %951 = vmatpush1.bf16.msra.mxu1 %v2015_v31 }
 0x26a   :  { %911 = vmatprep.subr.bf16.mxu0 %v2019_v32  ;;  %952 = vmatprep.subr.bf16.mxu1 %v2023_v33 }
 0x26d   :  { %912 = vmatpush1.bf16.msra.mxu0 %v2027_v34  ;;  %953 = vmatpush1.bf16.msra.mxu1 %v2029_v35 }
 0x26e   :  { %913 = vmatprep.subr.bf16.mxu0 %v2033_v36  ;;  %954 = vmatprep.subr.bf16.mxu1 %v2037_v37 }
 0x271   :  { %914 = vmatpush1.bf16.msra.mxu0 %v2043_v39  ;;  %955 = vmatpush1.bf16.msra.mxu1 %v2045_v40 }
 0x272   :  { %915 = vmatprep.subr.bf16.mxu0 %v2049_v41  ;;  %956 = vmatprep.subr.bf16.mxu1 %v2051_v42 }
 0x275   :  { %916 = vmatpush1.bf16.msra.mxu0 %v2057_v43  ;;  %957 = vmatpush1.bf16.msra.mxu1 %v2059_v44 }
 0x276   :  { %1015 = vmatprep.subr.bf16.mxu0 %v1955_v10  ;;  %1056 = vmatprep.subr.bf16.mxu1 %v1957_v11 }
 0x32b   :  { %v821_v29 = vpop.f32.mrb[24].mxu0  ;;  %v862_v62 = vpop.f32.mrb[24].mxu1 }
 0x32c   :  { %v869_v7 = vadd.f32 %v821_v29, %v2124_v8  ;;  %v871_v54 = vadd.f32 %v862_v62, %v2127_v19  ;;  %v823_v53 = vpop.f32.mrb[25].mxu0  ;;  %v864_v55 = vpop.f32.mrb[25].mxu1 }
 0x32d   :  { %v870_v56 = vadd.f32 %v823_v53, %v2129_v38  ;;  %v872_v58 = vadd.f32 %v864_v55, %v2527_v57  ;;  %v825_v0 = vpop.f32.mrb[26].mxu0  ;;  %v866_v59 = vpop.f32.mrb[26].mxu1  ;;  %v2529_v55 = vld [vmem:[#allocation20_spill] sm:$0xff] }
 0x32e   :  { %v873_v60 = vmul.f32 0.5, %v869_v7  ;;  %v826_v3 = vpop.f32.mrb[27].mxu0  ;;  %v867_v63 = vpop.f32.mrb[27].mxu1  ;;  %v2530_v0 = vld [vmem:[#allocation21_spill] sm:$0xff] }
 0x32f   :  { %v877_v1 = vmul.f32 0.5, %v870_v56  ;;  %v882_v2 = vmul.f32 0.5, %v872_v58 }
 0x330   :  { %1658 = vtanh.f32 %v873_v60  ;;  %v2531_v60 = vld [vmem:[#allocation22_spill] sm:$0xff] }
 0x331   :  { %1660 = vtanh.f32 %v877_v1 }
 0x332   :  { %1662 = vtanh.f32 %v871_v54  ;;  %v2528_v54 = vld [vmem:[#allocation19_spill] sm:$0xff] }
 0x333   :  { %1664 = vtanh.f32 %v882_v2 }
 0x33a   :  { %v1659_v46 = vpop.eup %1658 }
 0x33b   :  { %v1661_v8 = vpop.eup %1660  ;;  %v875_v48 = vmul.f32 0.5, %v1659_v46 }
 0x33c   :  { %v879_v19 = vmul.f32 0.5, %v1661_v8  ;;  %v1663_v50 = vpop.eup %1662 }
 0x33d   :  { %v876_v4 = vadd.f32 0.5, %v875_v48  ;;  %v1665_v52 = vpop.eup %1664 }
 0x33e   :  { %v880_v38 = vadd.f32 0.5, %v879_v19  ;;  %v884_v45 = vmul.f32 0.5, %v1665_v52 }
 0x33f   :  { %v887_v5 = vmul.f32 %v1663_v50, %v876_v4 }
 0x340   :  { %v886_v61 = vmul.f32 %v880_v38, %v2230_v9  ;;  %v885_v47 = vadd.f32 0.5, %v884_v45 }
 0x342   :  { %v2272_v49 = vadd.f32 %v887_v5, %v886_v61 }
 0x344   :  { %1666 = vtanh.f32 %v2272_v49 }
 0x34e   :  { %v1667_v51 = vpop.eup %1666 }
 0x34f   :  { %v890_v29 = vmul.f32 %v1667_v51, %v885_v47 }
 0x351   :  { %892 = vst [vmem:[#allocation11 + $0x10] sm:$0xff] %v890_v29  ;;  %v900_v62 = vpack.c.bf16 %v890_v29, %v890_v29 }
 0x353   :  { %934 = vmatmul.mubr.bf16.vlgmr.msra.gmra.mrb[28].mxu0 %v900_v62  ;;  %975 = vmatmul.mubr.bf16.vlgmr.msra.gmra.mrb[28].mxu1 %v900_v62 }
 0x354   :  { %1016 = vmatpush1.bf16.msra.mxu0 %v1959_v12  ;;  %1057 = vmatpush1.bf16.msra.mxu1 %v1961_v13 }
 0x355   :  { %1017 = vmatprep.subr.bf16.mxu0 %v1964_v14  ;;  %1058 = vmatprep.subr.bf16.mxu1 %v1967_v15 }
 0x356   :  { %1047 = vmatprep.mubr.bf16.mxu0 %v2526_v6  ;;  %1088 = vmatprep.mubr.bf16.mxu1 %v2526_v6 }
 0x358   :  { %1018 = vmatpush1.bf16.msra.mxu0 %v1971_v16  ;;  %1059 = vmatpush1.bf16.msra.mxu1 %v1975_v17 }
 0x359   :  { %1019 = vmatprep.subr.bf16.mxu0 %v1979_v18  ;;  %1060 = vmatprep.subr.bf16.mxu1 %v1983_v20 }
 0x35c   :  { %1020 = vmatpush1.bf16.msra.mxu0 %v1985_v21  ;;  %1061 = vmatpush1.bf16.msra.mxu1 %v1989_v22 }
 0x35d   :  { %1021 = vmatprep.subr.bf16.mxu0 %v1993_v23  ;;  %1062 = vmatprep.subr.bf16.mxu1 %v1995_v24 }
 0x360   :  { %1022 = vmatpush1.bf16.msra.mxu0 %v1999_v25  ;;  %1063 = vmatpush1.bf16.msra.mxu1 %v2003_v26 }
 0x361   :  { %1023 = vmatprep.subr.bf16.mxu0 %v2007_v27  ;;  %1064 = vmatprep.subr.bf16.mxu1 %v2009_v28 }
 0x364   :  { %1024 = vmatpush1.bf16.msra.mxu0 %v2013_v30  ;;  %1065 = vmatpush1.bf16.msra.mxu1 %v2015_v31 }
 0x365   :  { %1025 = vmatprep.subr.bf16.mxu0 %v2019_v32  ;;  %1066 = vmatprep.subr.bf16.mxu1 %v2023_v33 }
 0x368   :  { %1026 = vmatpush1.bf16.msra.mxu0 %v2027_v34  ;;  %1067 = vmatpush1.bf16.msra.mxu1 %v2029_v35 }
 0x369   :  { %1027 = vmatprep.subr.bf16.mxu0 %v2033_v36  ;;  %1068 = vmatprep.subr.bf16.mxu1 %v2037_v37 }
 0x36c   :  { %1028 = vmatpush1.bf16.msra.mxu0 %v2043_v39  ;;  %1069 = vmatpush1.bf16.msra.mxu1 %v2045_v40 }
 0x36d   :  { %1029 = vmatprep.subr.bf16.mxu0 %v2049_v41  ;;  %1070 = vmatprep.subr.bf16.mxu1 %v2051_v42 }
 0x370   :  { %1030 = vmatpush1.bf16.msra.mxu0 %v2057_v43  ;;  %1071 = vmatpush1.bf16.msra.mxu1 %v2059_v44 }
 0x371   :  { %1129 = vmatprep.subr.bf16.mxu0 %v1955_v10  ;;  %1170 = vmatprep.subr.bf16.mxu1 %v1957_v11 }
 0x426   :  { %v935_v9 = vpop.f32.mrb[28].mxu0  ;;  %v976_v7 = vpop.f32.mrb[28].mxu1 }
 0x427   :  { %v983_v53 = vadd.f32 %v935_v9, %v2528_v54  ;;  %v985_v56 = vadd.f32 %v976_v7, %v2529_v55  ;;  %v937_v57 = vpop.f32.mrb[29].mxu0  ;;  %v978_v58 = vpop.f32.mrb[29].mxu1 }
 0x428   :  { %v984_v59 = vadd.f32 %v937_v57, %v2530_v0  ;;  %v986_v3 = vadd.f32 %v978_v58, %v2531_v60  ;;  %v939_v63 = vpop.f32.mrb[30].mxu0  ;;  %v980_v1 = vpop.f32.mrb[30].mxu1 }
 0x429   :  { %v987_v2 = vmul.f32 0.5, %v983_v53  ;;  %v940_v46 = vpop.f32.mrb[31].mxu0  ;;  %v981_v8 = vpop.f32.mrb[31].mxu1 }
 0x42a   :  { %v991_v10 = vmul.f32 0.5, %v984_v59  ;;  %v996_v11 = vmul.f32 0.5, %v986_v3 }
 0x42b   :  { %1668 = vtanh.f32 %v987_v2 }
 0x42c   :  { %1670 = vtanh.f32 %v991_v10 }
 0x42d   :  { %1672 = vtanh.f32 %v985_v56 }
 0x42e   :  { %1674 = vtanh.f32 %v996_v11 }
 0x435   :  { %v1669_v48 = vpop.eup %1668 }
 0x436   :  { %v1671_v19 = vpop.eup %1670  ;;  %v989_v4 = vmul.f32 0.5, %v1669_v48 }
 0x437   :  { %v993_v50 = vmul.f32 0.5, %v1671_v19  ;;  %v1673_v5 = vpop.eup %1672  ;;  %v2363_v19 = vld [vmem:[#allocation10] ss:$16 sps:$4 sm:$0xff]  }
 0x438   :  { %v990_v38 = vadd.f32 0.5, %v989_v4  ;;  %v1675_v51 = vpop.eup %1674  ;;  %v2366_v4 = vld [vmem:[#allocation10 + $0x8] ss:$16 sps:$4 sm:$0xff]  }
 0x439   :  { %v994_v61 = vadd.f32 0.5, %v993_v50  ;;  %v998_v29 = vmul.f32 0.5, %v1675_v51  ;;  %v2369_v50 = vld [vmem:[#allocation10 + $0x24] ss:$16 sps:$4 sm:$0xff]   ;;  %v2392_v51 = vld [vmem:[#allocation10 + $0x48] ss:$16 sps:$4 sm:$0xff]  }
 0x43a   :  { %v1001_v52 = vmul.f32 %v1673_v5, %v990_v38  ;;  %v2372_v38 = vld [vmem:[#allocation10 + $0x2c] ss:$16 sps:$4 sm:$0xff]   ;;  %v2377_v5 = vld [vmem:[#allocation10 + $0x20] ss:$16 sps:$4 sm:$0xff]  }
 0x43b   :  { %v1000_v45 = vmul.f32 %v994_v61, %v2272_v49  ;;  %v999_v62 = vadd.f32 0.5, %v998_v29  ;;  %v2380_v61 = vld [vmem:[#allocation10 + $0x28] ss:$16 sps:$4 sm:$0xff]   ;;  %v2395_v29 = vld [vmem:[#allocation10 + $0x64] ss:$16 sps:$4 sm:$0xff]  }
 0x43d   :  { %v2314_v47 = vadd.f32 %v1001_v52, %v1000_v45  ;;  %v2383_v52 = vld [vmem:[#allocation10 + $0x44] ss:$16 sps:$4 sm:$0xff]   ;;  %v2386_v45 = vld [vmem:[#allocation10 + $0x4c] ss:$16 sps:$4 sm:$0xff]  }
 0x43f   :  { %1676 = vtanh.f32 %v2314_v47 }
 0x449   :  { %v1677_v9 = vpop.eup %1676 }
 0x44a   :  { %v1004_v7 = vmul.f32 %v1677_v9, %v999_v62  ;;  %v2398_v62 = vld [vmem:[#allocation10 + $0x6c] ss:$16 sps:$4 sm:$0xff]   ;;  %v2401_v9 = vld [vmem:[#allocation10 + $0x60] ss:$16 sps:$4 sm:$0xff]  }
 0x44c   :  { %1006 = vst [vmem:[#allocation11 + $0x18] sm:$0xff] %v1004_v7  ;;  %v1014_v54 = vpack.c.bf16 %v1004_v7, %v1004_v7  ;;  %v2404_v7 = vld [vmem:[#allocation10 + $0x68] ss:$16 sps:$4 sm:$0xff]  }
 0x44e   :  { %1048 = vmatmul.mubr.bf16.vlgmr.msra.gmra.mrb[32].mxu0 %v1014_v54  ;;  %1089 = vmatmul.mubr.bf16.vlgmr.msra.gmra.mrb[32].mxu1 %v1014_v54  ;;  %v2407_v54 = vld [vmem:[#allocation10 + $0x84] ss:$16 sps:$4 sm:$0xff]  }
 0x44f   :  { %1130 = vmatpush1.bf16.msra.mxu0 %v1959_v12  ;;  %1171 = vmatpush1.bf16.msra.mxu1 %v1961_v13  ;;  %v2349_v12 = vld [vmem:[#allocation10 + $0x4] ss:$16 sps:$4 sm:$0xff]   ;;  %v2352_v13 = vld [vmem:[#allocation10 + $0xc] ss:$16 sps:$4 sm:$0xff]  }
 0x450   :  { %1131 = vmatprep.subr.bf16.mxu0 %v1964_v14  ;;  %1172 = vmatprep.subr.bf16.mxu1 %v1967_v15 }
 0x451   :  { %1161 = vmatprep.mubr.bf16.mxu0 %v2526_v6  ;;  %1202 = vmatprep.mubr.bf16.mxu1 %v2526_v6 }
 0x453   :  { %1132 = vmatpush1.bf16.msra.mxu0 %v1971_v16  ;;  %1173 = vmatpush1.bf16.msra.mxu1 %v1975_v17  ;;  %v2532_v16 = vld [vmem:[#allocation23_spill] sm:$0xff] }
 0x454   :  { %1133 = vmatprep.subr.bf16.mxu0 %v1979_v18  ;;  %1174 = vmatprep.subr.bf16.mxu1 %v1983_v20  ;;  %v2533_v18 = vld [vmem:[#allocation24_spill] sm:$0xff] }
 0x457   :  { %1134 = vmatpush1.bf16.msra.mxu0 %v1985_v21  ;;  %1175 = vmatpush1.bf16.msra.mxu1 %v1989_v22 }
 0x458   :  { %1135 = vmatprep.subr.bf16.mxu0 %v1993_v23  ;;  %1176 = vmatprep.subr.bf16.mxu1 %v1995_v24  ;;  %v2534_v23 = vld [vmem:[#allocation25_spill] sm:$0xff] }
 0x45b   :  { %1136 = vmatpush1.bf16.msra.mxu0 %v1999_v25  ;;  %1177 = vmatpush1.bf16.msra.mxu1 %v2003_v26  ;;  %v2535_v25 = vld [vmem:[#allocation26_spill] sm:$0xff] }
 0x45c   :  { %1137 = vmatprep.subr.bf16.mxu0 %v2007_v27  ;;  %1178 = vmatprep.subr.bf16.mxu1 %v2009_v28 }
 0x45f   :  { %1138 = vmatpush1.bf16.msra.mxu0 %v2013_v30  ;;  %1179 = vmatpush1.bf16.msra.mxu1 %v2015_v31 }
 0x460   :  { %1139 = vmatprep.subr.bf16.mxu0 %v2019_v32  ;;  %1180 = vmatprep.subr.bf16.mxu1 %v2023_v33 }
 0x463   :  { %1140 = vmatpush1.bf16.msra.mxu0 %v2027_v34  ;;  %1181 = vmatpush1.bf16.msra.mxu1 %v2029_v35 }
 0x464   :  { %1141 = vmatprep.subr.bf16.mxu0 %v2033_v36  ;;  %1182 = vmatprep.subr.bf16.mxu1 %v2037_v37 }
 0x467   :  { %1142 = vmatpush1.bf16.msra.mxu0 %v2043_v39  ;;  %1183 = vmatpush1.bf16.msra.mxu1 %v2045_v40 }
 0x468   :  { %1143 = vmatprep.subr.bf16.mxu0 %v2049_v41  ;;  %1184 = vmatprep.subr.bf16.mxu1 %v2051_v42 }
 0x46b   :  { %1144 = vmatpush1.bf16.msra.mxu0 %v2057_v43  ;;  %1185 = vmatpush1.bf16.msra.mxu1 %v2059_v44 }
 0x46c   :  { %1243 = vmatprep.subr.bf16.mxu0 %v2349_v12  ;;  %1284 = vmatprep.subr.bf16.mxu1 %v2352_v13 }
 0x521   :  { %v1049_v14 = vpop.f32.mrb[32].mxu0  ;;  %v1090_v15 = vpop.f32.mrb[32].mxu1 }
 0x522   :  { %v1097_v17 = vadd.f32 %v1049_v14, %v2532_v16  ;;  %v1099_v20 = vadd.f32 %v1090_v15, %v2533_v18  ;;  %v1051_v21 = vpop.f32.mrb[33].mxu0  ;;  %v1092_v22 = vpop.f32.mrb[33].mxu1  ;;  %v2410_v14 = vld [vmem:[#allocation10 + $0x8c] ss:$16 sps:$4 sm:$0xff]   ;;  %v2413_v15 = vld [vmem:[#allocation10 + $0x80] ss:$16 sps:$4 sm:$0xff]  }
 0x523   :  { %v1098_v24 = vadd.f32 %v1051_v21, %v2534_v23  ;;  %v1100_v26 = vadd.f32 %v1092_v22, %v2535_v25  ;;  %v1053_v27 = vpop.f32.mrb[34].mxu0  ;;  %v1094_v28 = vpop.f32.mrb[34].mxu1  ;;  %v2416_v16 = vld [vmem:[#allocation10 + $0x88] ss:$16 sps:$4 sm:$0xff]  }
 0x524   :  { %v1101_v30 = vmul.f32 0.5, %v1097_v17  ;;  %v1054_v31 = vpop.f32.mrb[35].mxu0  ;;  %v1095_v32 = vpop.f32.mrb[35].mxu1  ;;  %v2419_v17 = vld [vmem:[#allocation10 + $0xa4] ss:$16 sps:$4 sm:$0xff]   ;;  %v2539_v21 = vld [vmem:[#allocation30_spill] sm:$0xff] }
 0x525   :  { %v1105_v49 = vmul.f32 0.5, %v1098_v24  ;;  %v1110_v53 = vmul.f32 0.5, %v1100_v26 }
 0x526   :  { %1678 = vtanh.f32 %v1101_v30 }
 0x527   :  { %1680 = vtanh.f32 %v1105_v49 }
 0x528   :  { %1682 = vtanh.f32 %v1099_v20  ;;  %v2538_v20 = vld [vmem:[#allocation29_spill] sm:$0xff] }
 0x529   :  { %1684 = vtanh.f32 %v1110_v53 }
 0x530   :  { %v1679_v55 = vpop.eup %1678 }
 0x531   :  { %v1681_v56 = vpop.eup %1680  ;;  %v1103_v57 = vmul.f32 0.5, %v1679_v55 }
 0x532   :  { %v1107_v58 = vmul.f32 0.5, %v1681_v56  ;;  %v1683_v59 = vpop.eup %1682 }
 0x533   :  { %v1104_v0 = vadd.f32 0.5, %v1103_v57  ;;  %v1685_v2 = vpop.eup %1684 }
 0x534   :  { %v1108_v60 = vadd.f32 0.5, %v1107_v58  ;;  %v1112_v46 = vmul.f32 0.5, %v1685_v2  ;;  %v1743_v2 = vld [vmem:[#allocation10 + $0xcc] ss:$16 sps:$4 sm:$0xff]  }
 0x535   :  { %v1115_v3 = vmul.f32 %v1683_v59, %v1104_v0 }
 0x536   :  { %v1114_v63 = vmul.f32 %v1108_v60, %v2314_v47  ;;  %v1113_v8 = vadd.f32 0.5, %v1112_v46  ;;  %v2389_v47 = vld [vmem:[#allocation10 + $0x40] ss:$16 sps:$4 sm:$0xff]  }
 0x537   :  { %v1744_v46 = vld [vmem:[#allocation10 + $0xc0] ss:$16 sps:$4 sm:$0xff]  }
 0x538   :  { %v2360_v1 = vadd.f32 %v1115_v3, %v1114_v63  ;;  %v1740_v3 = vld [vmem:[#allocation10 + $0xa0] ss:$16 sps:$4 sm:$0xff]   ;;  %v1741_v63 = vld [vmem:[#allocation10 + $0xa8] ss:$16 sps:$4 sm:$0xff]  }
 0x53a   :  { %1686 = vtanh.f32 %v2360_v1 }
 0x544   :  { %v1687_v10 = vpop.eup %1686 }
 0x545   :  { %v1118_v11 = vmul.f32 %v1687_v10, %v1113_v8  ;;  %v1745_v8 = vld [vmem:[#allocation10 + $0xc8] ss:$16 sps:$4 sm:$0xff]   ;;  %v1746_v10 = vld [vmem:[#allocation10 + $0xe4] ss:$16 sps:$4 sm:$0xff]  }
 0x547   :  { %1120 = vst [vmem:[#allocation11 + $0x20] sm:$0xff] %v1118_v11  ;;  %v1128_v48 = vpack.c.bf16 %v1118_v11, %v1118_v11  ;;  %v1747_v11 = vld [vmem:[#allocation10 + $0xec] ss:$16 sps:$4 sm:$0xff]  }
 0x549   :  { %1162 = vmatmul.mubr.bf16.vlgmr.msra.gmra.mrb[36].mxu0 %v1128_v48  ;;  %1203 = vmatmul.mubr.bf16.vlgmr.msra.gmra.mrb[36].mxu1 %v1128_v48  ;;  %v1748_v48 = vld [vmem:[#allocation10 + $0xe0] ss:$16 sps:$4 sm:$0xff]  }
 0x54a   :  { %1244 = vmatpush1.bf16.msra.mxu0 %v2363_v19  ;;  %1285 = vmatpush1.bf16.msra.mxu1 %v2366_v4 }
 0x54b   :  { %1245 = vmatprep.subr.bf16.mxu0 %v2369_v50  ;;  %1286 = vmatprep.subr.bf16.mxu1 %v2372_v38 }
 0x54c   :  { %1275 = vmatprep.mubr.bf16.mxu0 %v2526_v6  ;;  %1316 = vmatprep.mubr.bf16.mxu1 %v2526_v6 }
 0x54e   :  { %1246 = vmatpush1.bf16.msra.mxu0 %v2377_v5  ;;  %1287 = vmatpush1.bf16.msra.mxu1 %v2380_v61 }
 0x54f   :  { %1247 = vmatprep.subr.bf16.mxu0 %v2383_v52  ;;  %1288 = vmatprep.subr.bf16.mxu1 %v2386_v45 }
 0x552   :  { %1248 = vmatpush1.bf16.msra.mxu0 %v2389_v47  ;;  %1289 = vmatpush1.bf16.msra.mxu1 %v2392_v51 }
 0x553   :  { %1249 = vmatprep.subr.bf16.mxu0 %v2395_v29  ;;  %1290 = vmatprep.subr.bf16.mxu1 %v2398_v62 }
 0x556   :  { %1250 = vmatpush1.bf16.msra.mxu0 %v2401_v9  ;;  %1291 = vmatpush1.bf16.msra.mxu1 %v2404_v7 }
 0x557   :  { %1251 = vmatprep.subr.bf16.mxu0 %v2407_v54  ;;  %1292 = vmatprep.subr.bf16.mxu1 %v2410_v14 }
 0x55a   :  { %1252 = vmatpush1.bf16.msra.mxu0 %v2413_v15  ;;  %1293 = vmatpush1.bf16.msra.mxu1 %v2416_v16 }
 0x55b   :  { %1253 = vmatprep.subr.bf16.mxu0 %v2419_v17  ;;  %1294 = vmatprep.subr.bf16.mxu1 %v2023_v33 }
 0x55e   :  { %1254 = vmatpush1.bf16.msra.mxu0 %v2027_v34  ;;  %1295 = vmatpush1.bf16.msra.mxu1 %v2029_v35  ;;  %v2536_v35 = vld [vmem:[#allocation27_spill] sm:$0xff] }
 0x55f   :  { %1255 = vmatprep.subr.bf16.mxu0 %v2033_v36  ;;  %1296 = vmatprep.subr.bf16.mxu1 %v2037_v37  ;;  %v2537_v37 = vld [vmem:[#allocation28_spill] sm:$0xff] }
 0x562   :  { %1256 = vmatpush1.bf16.msra.mxu0 %v2043_v39  ;;  %1297 = vmatpush1.bf16.msra.mxu1 %v2045_v40 }
 0x563   :  { %1257 = vmatprep.subr.bf16.mxu0 %v2049_v41  ;;  %1298 = vmatprep.subr.bf16.mxu1 %v2051_v42 }
 0x566   :  { %1258 = vmatpush1.bf16.msra.mxu0 %v2057_v43  ;;  %1299 = vmatpush1.bf16.msra.mxu1 %v2059_v44 }
 0x567   :  { %1357 = vmatprep.subr.bf16.mxu0 %v2349_v12  ;;  %1398 = vmatprep.subr.bf16.mxu1 %v2352_v13 }
 0x61c   :  { %v1163_v33 = vpop.f32.mrb[36].mxu0  ;;  %v1204_v34 = vpop.f32.mrb[36].mxu1 }
 0x61d   :  { %v1211_v36 = vadd.f32 %v1163_v33, %v2536_v35  ;;  %v1213_v39 = vadd.f32 %v1204_v34, %v2537_v37  ;;  %v1165_v18 = vpop.f32.mrb[37].mxu0  ;;  %v1206_v40 = vpop.f32.mrb[37].mxu1 }
 0x61e   :  { %v1212_v41 = vadd.f32 %v1165_v18, %v2538_v20  ;;  %v1214_v42 = vadd.f32 %v1206_v40, %v2539_v21  ;;  %v1167_v22 = vpop.f32.mrb[38].mxu0  ;;  %v1208_v43 = vpop.f32.mrb[38].mxu1 }
 0x61f   :  { %v1215_v23 = vmul.f32 0.5, %v1211_v36  ;;  %v1168_v44 = vpop.f32.mrb[39].mxu0  ;;  %v1209_v24 = vpop.f32.mrb[39].mxu1 }
 0x620   :  { %v1219_v12 = vmul.f32 0.5, %v1212_v41  ;;  %v1224_v13 = vmul.f32 0.5, %v1214_v42 }
 0x621   :  { %1688 = vtanh.f32 %v1215_v23 }
 0x622   :  { %1690 = vtanh.f32 %v1219_v12 }
 0x623   :  { %1692 = vtanh.f32 %v1213_v39 }
 0x624   :  { %1694 = vtanh.f32 %v1224_v13 }
 0x62b   :  { %v1689_v25 = vpop.eup %1688 }
 0x62c   :  { %v1691_v26 = vpop.eup %1690  ;;  %v1217_v27 = vmul.f32 0.5, %v1689_v25  ;;  %v2544_v25 = vld [vmem:[#allocation35_spill] sm:$0xff] }
 0x62d   :  { %v1221_v28 = vmul.f32 0.5, %v1691_v26  ;;  %v1693_v31 = vpop.eup %1692 }
 0x62e   :  { %v1218_v30 = vadd.f32 0.5, %v1217_v27  ;;  %v1695_v56 = vpop.eup %1694  ;;  %v2545_v27 = vld [vmem:[#allocation36_spill] sm:$0xff] }
 0x62f   :  { %v1222_v32 = vadd.f32 0.5, %v1221_v28  ;;  %v1226_v57 = vmul.f32 0.5, %v1695_v56 }
 0x630   :  { %v1229_v49 = vmul.f32 %v1693_v31, %v1218_v30 }
 0x631   :  { %v1228_v53 = vmul.f32 %v1222_v32, %v2360_v1  ;;  %v1227_v58 = vadd.f32 0.5, %v1226_v57  ;;  %v1742_v1 = vld [vmem:[#allocation10 + $0xc4] ss:$16 sps:$4 sm:$0xff]  }
 0x632   :  { %v2546_v32 = vld [vmem:[#allocation37_spill] sm:$0xff] }
 0x633   :  { %v2440_v55 = vadd.f32 %v1229_v49, %v1228_v53  ;;  %v2547_v53 = vld [vmem:[#allocation38_spill] sm:$0xff] }
 0x635   :  { %1696 = vtanh.f32 %v2440_v55 }
 0x63f   :  { %v1697_v0 = vpop.eup %1696 }
 0x640   :  { %v1232_v59 = vmul.f32 %v1697_v0, %v1227_v58 }
 0x642   :  { %1234 = vst [vmem:[#allocation11 + $0x28] sm:$0xff] %v1232_v59  ;;  %v1242_v60 = vpack.c.bf16 %v1232_v59, %v1232_v59 }
 0x644   :  { %1276 = vmatmul.mubr.bf16.vlgmr.msra.gmra.mrb[40].mxu0 %v1242_v60  ;;  %1317 = vmatmul.mubr.bf16.vlgmr.msra.gmra.mrb[40].mxu1 %v1242_v60 }
 0x645   :  { %1358 = vmatpush1.bf16.msra.mxu0 %v2363_v19  ;;  %1399 = vmatpush1.bf16.msra.mxu1 %v2366_v4  ;;  %v1749_v19 = vld [vmem:[#allocation10 + $0xe8] ss:$16 sps:$4 sm:$0xff]  }
 0x646   :  { %1359 = vmatprep.subr.bf16.mxu0 %v2369_v50  ;;  %1400 = vmatprep.subr.bf16.mxu1 %v2372_v38  ;;  %v2540_v38 = vld [vmem:[#allocation31_spill] sm:$0xff] }
 0x647   :  { %1389 = vmatprep.mubr.bf16.mxu0 %v2526_v6  ;;  %1430 = vmatprep.mubr.bf16.mxu1 %v2526_v6  ;;  %v1739_v6 = vld [vmem:[#allocation10 + $0xac] ss:$16 sps:$4 sm:$0xff]  }
 0x649   :  { %1360 = vmatpush1.bf16.msra.mxu0 %v2377_v5  ;;  %1401 = vmatpush1.bf16.msra.mxu1 %v2380_v61  ;;  %v2541_v61 = vld [vmem:[#allocation32_spill] sm:$0xff] }
 0x64a   :  { %1361 = vmatprep.subr.bf16.mxu0 %v2383_v52  ;;  %1402 = vmatprep.subr.bf16.mxu1 %v2386_v45 }
 0x64d   :  { %1362 = vmatpush1.bf16.msra.mxu0 %v2389_v47  ;;  %1403 = vmatpush1.bf16.msra.mxu1 %v2392_v51  ;;  %v2542_v51 = vld [vmem:[#allocation33_spill] sm:$0xff] }
 0x64e   :  { %1363 = vmatprep.subr.bf16.mxu0 %v2395_v29  ;;  %1404 = vmatprep.subr.bf16.mxu1 %v2398_v62  ;;  %v2543_v62 = vld [vmem:[#allocation34_spill] sm:$0xff] }
 0x651   :  { %1364 = vmatpush1.bf16.msra.mxu0 %v2401_v9  ;;  %1405 = vmatpush1.bf16.msra.mxu1 %v2404_v7 }
 0x652   :  { %1365 = vmatprep.subr.bf16.mxu0 %v2407_v54  ;;  %1406 = vmatprep.subr.bf16.mxu1 %v2410_v14 }
 0x655   :  { %1366 = vmatpush1.bf16.msra.mxu0 %v2413_v15  ;;  %1407 = vmatpush1.bf16.msra.mxu1 %v2416_v16 }
 0x656   :  { %1367 = vmatprep.subr.bf16.mxu0 %v2419_v17  ;;  %1408 = vmatprep.subr.bf16.mxu1 %v1739_v6 }
 0x659   :  { %1368 = vmatpush1.bf16.msra.mxu0 %v1740_v3  ;;  %1409 = vmatpush1.bf16.msra.mxu1 %v1741_v63 }
 0x65a   :  { %1369 = vmatprep.subr.bf16.mxu0 %v1742_v1  ;;  %1410 = vmatprep.subr.bf16.mxu1 %v1743_v2 }
 0x65d   :  { %1370 = vmatpush1.bf16.msra.mxu0 %v1744_v46  ;;  %1411 = vmatpush1.bf16.msra.mxu1 %v1745_v8 }
 0x65e   :  { %1371 = vmatprep.subr.bf16.mxu0 %v1746_v10  ;;  %1412 = vmatprep.subr.bf16.mxu1 %v1747_v11 }
 0x661   :  { %1372 = vmatpush1.bf16.msra.mxu0 %v1748_v48  ;;  %1413 = vmatpush1.bf16.msra.mxu1 %v1749_v19 }
 0x717   :  { %v1277_v4 = vpop.f32.mrb[40].mxu0  ;;  %v1318_v50 = vpop.f32.mrb[40].mxu1 }
 0x718   :  { %v1325_v5 = vadd.f32 %v1277_v4, %v2540_v38  ;;  %v1327_v52 = vadd.f32 %v1318_v50, %v2541_v61  ;;  %v1279_v45 = vpop.f32.mrb[41].mxu0  ;;  %v1320_v47 = vpop.f32.mrb[41].mxu1 }
 0x719   :  { %v1326_v29 = vadd.f32 %v1279_v45, %v2542_v51  ;;  %v1328_v9 = vadd.f32 %v1320_v47, %v2543_v62  ;;  %v1281_v7 = vpop.f32.mrb[42].mxu0  ;;  %v1322_v54 = vpop.f32.mrb[42].mxu1 }
 0x71a   :  { %v1329_v14 = vmul.f32 0.5, %v1325_v5  ;;  %v1282_v15 = vpop.f32.mrb[43].mxu0  ;;  %v1323_v16 = vpop.f32.mrb[43].mxu1 }
 0x71b   :  { %v1333_v17 = vmul.f32 0.5, %v1326_v29  ;;  %v1338_v33 = vmul.f32 0.5, %v1328_v9 }
 0x71c   :  { %1698 = vtanh.f32 %v1329_v14 }
 0x71d   :  { %1700 = vtanh.f32 %v1333_v17 }
 0x71e   :  { %1702 = vtanh.f32 %v1327_v52 }
 0x71f   :  { %1704 = vtanh.f32 %v1338_v33 }
 0x726   :  { %v1699_v34 = vpop.eup %1698 }
 0x727   :  { %v1701_v35 = vpop.eup %1700  ;;  %v1331_v36 = vmul.f32 0.5, %v1699_v34 }
 0x728   :  { %v1335_v37 = vmul.f32 0.5, %v1701_v35  ;;  %v1703_v18 = vpop.eup %1702 }
 0x729   :  { %v1332_v39 = vadd.f32 0.5, %v1331_v36  ;;  %v1705_v42 = vpop.eup %1704 }
 0x72a   :  { %v1336_v40 = vadd.f32 0.5, %v1335_v37  ;;  %v1340_v22 = vmul.f32 0.5, %v1705_v42 }
 0x72b   :  { %v1343_v20 = vmul.f32 %v1703_v18, %v1332_v39 }
 0x72c   :  { %v1342_v41 = vmul.f32 %v1336_v40, %v2440_v55  ;;  %v1341_v43 = vadd.f32 0.5, %v1340_v22 }
 0x72e   :  { %v1344_v21 = vadd.f32 %v1343_v20, %v1342_v41 }
 0x730   :  { %1706 = vtanh.f32 %v1344_v21 }
 0x73a   :  { %v1707_v23 = vpop.eup %1706 }
 0x73b   :  { %v1346_v44 = vmul.f32 %v1707_v23, %v1341_v43 }
 0x73d   :  { %1348 = vst [vmem:[#allocation11 + $0x30] sm:$0xff] %v1346_v44  ;;  %v1356_v24 = vpack.c.bf16 %v1346_v44, %v1346_v44 }
 0x73f   :  { %1390 = vmatmul.mubr.bf16.vlgmr.msra.gmra.mrb[44].mxu0 %v1356_v24  ;;  %1431 = vmatmul.mubr.bf16.vlgmr.msra.gmra.mrb[44].mxu1 %v1356_v24 }
 0x812   :  { %v1391_v12 = vpop.f32.mrb[44].mxu0  ;;  %v1432_v13 = vpop.f32.mrb[44].mxu1 }
 0x813   :  { %v1439_v26 = vadd.f32 %v1391_v12, %v2544_v25  ;;  %v1441_v28 = vadd.f32 %v1432_v13, %v2545_v27  ;;  %v1393_v30 = vpop.f32.mrb[45].mxu0  ;;  %v1434_v31 = vpop.f32.mrb[45].mxu1 }
 0x814   :  { %v1440_v49 = vadd.f32 %v1393_v30, %v2546_v32  ;;  %v1442_v55 = vadd.f32 %v1434_v31, %v2547_v53  ;;  %v1395_v56 = vpop.f32.mrb[46].mxu0  ;;  %v1436_v57 = vpop.f32.mrb[46].mxu1 }
 0x815   :  { %v1443_v58 = vmul.f32 0.5, %v1439_v26  ;;  %v1396_v0 = vpop.f32.mrb[47].mxu0  ;;  %v1437_v59 = vpop.f32.mrb[47].mxu1 }
 0x816   :  { %v1447_v60 = vmul.f32 0.5, %v1440_v49  ;;  %v1452_v6 = vmul.f32 0.5, %v1442_v55 }
 0x817   :  { %1708 = vtanh.f32 %v1443_v58 }
 0x818   :  { %1710 = vtanh.f32 %v1447_v60 }
 0x819   :  { %1712 = vtanh.f32 %v1441_v28 }
 0x81a   :  { %1714 = vtanh.f32 %v1452_v6 }
 0x821   :  { %v1709_v3 = vpop.eup %1708 }
 0x822   :  { %v1711_v63 = vpop.eup %1710  ;;  %v1445_v1 = vmul.f32 0.5, %v1709_v3 }
 0x823   :  { %v1449_v2 = vmul.f32 0.5, %v1711_v63  ;;  %v1713_v8 = vpop.eup %1712 }
 0x824   :  { %v1446_v46 = vadd.f32 0.5, %v1445_v1 }
 0x825   :  { %v1450_v10 = vadd.f32 0.5, %v1449_v2 }
 0x826   :  { %v1457_v11 = vmul.f32 %v1713_v8, %v1446_v46 }
 0x827   :  { %v1456_v48 = vmul.f32 %v1450_v10, %v1344_v21 }
 0x829   :  { %v1458_v19 = vadd.f32 %v1457_v11, %v1456_v48 }
 0x82b   :  { %1716 = vtanh.f32 %v1458_v19  ;;  %1469 = vst [vmem:[#allocation12] sm:$0xff] %v1458_v19 }
 0x82c   :  { %1827 = shalt.err (!%p1824_p0)
}
 0x82d   :  { %s1828_s11 = scalar_lea.hbm %s2502_s5, 128 }
 0x82e   :  { %p1829_p1 = scmp.ne.s32.totalorder %s2502_s5, %s1828_s11  ;;  %p1832_p2 = scmp.lt.u32.totalorder %s1828_s11, %s2502_s5 }
 0x830   :  { %p1834_p3 = pnand %p1832_p2, %p1829_p1 }
 0x832   :  { %1837 = shalt.err (!%p1834_p3)
}
 0x833   :  { %1491 = dma.vmem_to_hbm [thread:$0]  %s1489_s29, 128, %s2502_s5, [#allocation13]   ;;  %v1715_v4 = vpop.eup %1714 }
 0x834   :  { %v1454_v50 = vmul.f32 0.5, %v1715_v4  ;;  %s1878_s17 = smov [#allocation11]  }
 0x835   :  { %s1475_s18 = sshll.u32 %s1878_s17, 4  ;;  %v1717_v5 = vpop.eup %1716  ;;  %s1476_s18 = int_to_ptr.vmem [resolvable:$true] %s1475_s18 }
 0x836   :  { %v1455_v38 = vadd.f32 0.5, %v1454_v50  ;;  %s1838_s19 = scalar_lea.vmem %s1476_s18, 1024  ;;  %p1843_p5 = scmp.lt.s32.totalorder %s1476_s18, %s1476_s18 }
 0x837   :  { %p1839_p4 = scmp.ne.s32.totalorder %s1476_s18, %s1838_s19  ;;  %p1844_p6 = scmp.lt.s32.totalorder %s1838_s19, %s1838_s19 }
 0x838   :  { %v1460_v61 = vmul.f32 %v1717_v5, %v1455_v38 }
 0x839   :  { %p1845_p7 = por %p1844_p6, %p1843_p5 }
 0x83a   :  { %1462 = vst [vmem:[#allocation11 + $0x38] sm:$0xff] %v1460_v61 }
 0x83b   :  { %p1846_p8 = pnand %p1845_p7, %p1839_p4 }
 0x83d   :  { %1849 = shalt.err (!%p1846_p8)
}
 0x83e   :  { %s1850_s5 = scalar_lea.hbm %s2501_s4, 1024 }
 0x83f   :  { %p1851_p9 = scmp.ne.s32.totalorder %s2501_s4, %s1850_s5  ;;  %p1854_p10 = scmp.lt.u32.totalorder %s1850_s5, %s2501_s4 }
 0x841   :  { %p1856_p11 = pnand %p1854_p10, %p1851_p9 }
 0x843   :  { %1859 = shalt.err (!%p1856_p11)
}
 0x844   :  { %s1879_s26 = smov 128   ;;  %s1880_s27 = smov 8  }
 0x845   :  { %1481 = dma.vmem_to_hbm [thread:$0]  %s1476_s18, 1024, %s2501_s4, [#allocation7], %s1879_s26, %s1879_s26, %s1880_s27  }
 0x846   :  { %1864 = dma.done.wait [#allocation7], 1024  }
 0x847   :  { %1865 = vsyncadd [#allocation7], 4294966272 }
 0x848   :  { %1866 = dma.done.wait [#allocation13], 128  }
 0x849   :  { %1867 = vsyncadd [#allocation13], 4294967168 }
 0x84a   :  { %1498 = vsyncpa [#allocation6], 1 }
 0x84b   :  { %1499 = vsyncpa [#allocation9], 1 }
 0x84c   :  { %1500 = vsyncpa [#allocation7], 1 }
 0x84d   :  { %1501 = vsyncpa [#allocation13], 1 }

</bundles_post_ra>
